<compile_context>
chip_gen: v7x
topology: tpu7x:2x2x1
jax: 0.10.0
libtpu: 0.0.40
codegen_flags: <defaults>
</compile_context>

<pallas_src>
import functools

import jax
import jax.numpy as jnp
from jax.experimental import pallas as pl
from jax.experimental.pallas import tpu as pltpu


def _round_up(x, m):
    return (x + m - 1) // m * m


def _mysconv_kernel(x_ref, w_ref, o_ref, *, H, W, Wp, Cin, Cout, eps):
    # x_ref: (1, H+3, Wp, Cin) bf16, padded (1 replicate row top / 1 replicate + 1 zero row bottom,
    #        1 replicate col left / 1 replicate + Wp-W-2 zero cols right)
    # w_ref: (9, Cin, Cout) bf16, taps ordered (kh, kw)
    # o_ref: (1, H, W, Cout)
    Hp = H + 3
    # bf16 all the way through the shift / tap stage. Wp % 16 == 0 keeps the reshape and the
    # kh*Wp row slices tile-aligned for packed bf16.
    flat = x_ref[0].reshape(Hp * Wp, Cin)          # row-major: (h, w, :) lives at row h*Wp + w
    n_rows = H * Wp                                # conv rows incl. padded cols W..Wp-1 (cropped later)
    span = (H + 2) * Wp
    # One sublane shift per kw != 0, shared across all kh; kw == 0 uses `flat` directly.
    shifted = (flat, flat[1:1 + span, :], flat[2:2 + span, :])

    # 9 per-tap MXU matmuls accumulated in f32 — no im2col patch is materialized.
    # (Cout=128 half-fills the 256-wide MXU on v6e/v7x; that is structural, the kernel is
    #  copy/store-bound, not MXU-bound.)
    acc = None
    for kh in range(3):
        base = kh * Wp                             # multiple of Wp -> tile-aligned slice start
        for kw in range(3):
            tap = shifted[kw][base:base + n_rows, :]                    # (H*Wp, Cin) bf16
            part = jnp.dot(tap, w_ref[kh * 3 + kw],
                           preferred_element_type=jnp.float32)          # (H*Wp, Cout) f32
            acc = part if acc is None else acc + part

    # Crop the padded columns ONCE on the f32 accumulator (aligned when W % 8 == 0; correct either way).
    y = acc.reshape(H, Wp, Cout)[:, :W, :].reshape(H * W, Cout)

    # InstanceNorm2d(affine=False): two-pass (centered) statistics, then ReLU.
    inv_m = 1.0 / (H * W)
    mean = jnp.sum(y, axis=0, keepdims=True) * inv_m
    centered = y - mean
    var = jnp.sum(centered * centered, axis=0, keepdims=True) * inv_m
    out = jnp.maximum(centered * jax.lax.rsqrt(var + eps), 0.0)
    o_ref[...] = out.reshape(1, H, W, Cout).astype(o_ref.dtype)


def _derive_vmem_limit(H, W, Wp, Cin, Cout, out_bytes):
    """vmem_limit_bytes derived from the actual block shapes (double-buffered I/O + intermediates)."""
    bf16, f32 = 2, 4
    in_blk = (H + 3) * Wp * Cin * bf16
    w_blk = 9 * Cin * Cout * bf16
    out_blk = H * W * Cout * out_bytes
    shifts = 2 * (H + 2) * Wp * Cin * bf16        # kw = 1, 2 shifted copies
    acc = H * Wp * Cout * f32                     # accumulator (+ one dot result in flight)
    normed = 3 * H * W * Cout * f32               # cropped / centered / normalized temporaries
    est = 2 * (in_blk + out_blk) + 2 * w_blk + shifts + 2 * acc + normed
    # generous headroom for compiler temporaries; stay under the smallest physical VMEM (v7x: 64 MiB)
    return min(max(2 * est + (8 << 20), 16 << 20), 56 << 20)


def mysconv_forward_nhwc(x_nhwc, weight, *, eps=1e-5, out_dtype=jnp.bfloat16):
    """ReplicationPad(1) -> Conv3x3 -> InstanceNorm(affine=False) -> ReLU on NHWC input.

    This is the chaining entry point: stacked blocks should stay in NHWC bf16 and consume each
    other's output directly (no per-block NCHW<->NHWC transposes, bf16 HBM traffic between blocks).
    """
    N, H, W, Cin = x_nhwc.shape
    Cout = weight.shape[0]
    assert weight.shape == (Cout, Cin, 3, 3), "expects a 3x3 conv weight (Cout, Cin, 3, 3)"

    # W padded to a multiple of 16 so the in-kernel bf16 reshape / row slices stay tile-aligned.
    Wp = _round_up(W + 2, 16)
    Hp = H + 3
    # Load-bearing padding invariants for the flattened-row kw shift (see kernel).
    assert Wp >= W + 2 and Hp == H + 3

    x_bf = x_nhwc.astype(jnp.bfloat16)
    # ReplicationPad2d(padding=1) ring, then extra zero row / cols that only feed cropped outputs.
    x_rep = jnp.pad(x_bf, ((0, 0), (1, 1), (1, 1), (0, 0)), mode="edge")
    x_pad = jnp.pad(x_rep, ((0, 0), (0, 1), (0, Wp - (W + 2)), (0, 0)))        # (N, H+3, Wp, Cin)

    # Weights packed as (9, Cin, Cout) bf16, taps ordered (kh, kw).
    w_packed = jnp.transpose(weight, (2, 3, 1, 0)).reshape(9, Cin, Cout).astype(jnp.bfloat16)

    kernel = functools.partial(_mysconv_kernel, H=H, W=W, Wp=Wp, Cin=Cin, Cout=Cout, eps=eps)
    vmem_limit = _derive_vmem_limit(H, W, Wp, Cin, Cout, jnp.dtype(out_dtype).itemsize)

    return pl.pallas_call(
        kernel,
        out_shape=jax.ShapeDtypeStruct((N, H, W, Cout), out_dtype),
        grid_spec=pltpu.PrefetchScalarGridSpec(
            num_scalar_prefetch=0,
            grid=(N,),   # one grid step per sample: the InstanceNorm reduction stays in-kernel
            in_specs=[
                pl.BlockSpec((1, H + 3, Wp, Cin), lambda n: (n, 0, 0, 0)),
                # constant block index -> weights are fetched once, not per grid step
                pl.BlockSpec((9, Cin, Cout), lambda n: (0, 0, 0)),
            ],
            out_specs=pl.BlockSpec((1, H, W, Cout), lambda n: (n, 0, 0, 0)),
        ),
        compiler_params=pltpu.CompilerParams(
            dimension_semantics=("parallel",),   # megacore shards the batch (v7x); no-op on v5e/v6e
            vmem_limit_bytes=vmem_limit,
        ),
    )(x_pad, w_packed)


def mysconv_forward(x_nchw, weight, bias=None, *, stride=1, eps=1e-5, out_dtype=None):
    """NCHW convenience wrapper (matches the PyTorch block's calling convention).

    `bias` is accepted for API compatibility but unused: it is cancelled exactly by the mean
    subtraction of the affine-free per-channel norm that follows the conv.
    """
    if stride != 1:
        raise NotImplementedError("only stride=1 is supported")  # TODO(synk): stride=2 encoder variant
    del bias
    out_dtype = x_nchw.dtype if out_dtype is None else out_dtype
    x_nhwc = jnp.transpose(x_nchw, (0, 2, 3, 1))
    out_nhwc = mysconv_forward_nhwc(x_nhwc, weight, eps=eps, out_dtype=out_dtype)
    return jnp.transpose(out_nhwc, (0, 3, 1, 2))


def _reference(x_nchw, weight, bias, *, eps=1e-5):
    """Pure-JAX f32 reference: ReplicationPad(1) + Conv3x3 + bias + InstanceNorm(affine=False) + ReLU.

    Inputs / weights are quantized to bf16 first — the kernel deliberately runs the MXU in bf16
    (f32 accumulation), so the reference reflects that documented choice; bias is kept in f32 to
    verify that the norm cancels it exactly.
    """
    xq = x_nchw.astype(jnp.bfloat16).astype(jnp.float32)
    wq = weight.astype(jnp.bfloat16).astype(jnp.float32)
    xp = jnp.pad(xq, ((0, 0), (0, 0), (1, 1), (1, 1)), mode="edge")
    y = jax.lax.conv_general_dilated(
        xp, wq, window_strides=(1, 1), padding="VALID",
        dimension_numbers=("NCHW", "OIHW", "NCHW"),
        precision=jax.lax.Precision.HIGHEST,
    ) + bias.reshape(1, -1, 1, 1).astype(jnp.float32)
    mean = jnp.mean(y, axis=(2, 3), keepdims=True)
    var = jnp.mean((y - mean) ** 2, axis=(2, 3), keepdims=True)
    y = (y - mean) * jax.lax.rsqrt(var + eps)
    return jnp.maximum(y, 0.0)


if __name__ == "__main__":
    # Block defaults from the module: num_filter=128, in_channels=128, stride=1; small spatial size.
    N, Cin, Cout, H, W = 2, 128, 128, 16, 16

    key = jax.random.PRNGKey(0)
    kx, kw_, kb = jax.random.split(key, 3)
    x = jax.random.normal(kx, (N, Cin, H, W), dtype=jnp.float32)
    weight = jax.random.normal(kw_, (Cout, Cin, 3, 3), dtype=jnp.float32) * 0.05
    bias = jax.random.normal(kb, (Cout,), dtype=jnp.float32) * 0.1

    out = jax.block_until_ready(mysconv_forward(x, weight, bias))
    ref = jax.block_until_ready(_reference(x, weight, bias))

    assert out.shape == (N, Cout, H, W)
    max_err = float(jnp.max(jnp.abs(out - ref)))
    assert jnp.allclose(out, ref, rtol=1e-2, atol=1e-2), f"mismatch vs reference, max abs err={max_err}"

    # Chained-block path: two blocks back-to-back in NHWC bf16 (no intermediate transposes / f32 HBM).
    x_nhwc = jnp.transpose(x, (0, 2, 3, 1))
    y1 = mysconv_forward_nhwc(x_nhwc, weight, out_dtype=jnp.bfloat16)
    y2 = jax.block_until_ready(mysconv_forward_nhwc(y1, weight, out_dtype=jnp.bfloat16))
    assert y2.shape == (N, H, W, Cout)
    assert bool(jnp.all(jnp.isfinite(y2.astype(jnp.float32))))

    print("KERNEL_OK")
</pallas_src>

<mosaic_0001>
module attributes {stable_mosaic.version = 11 : i64} {
  func.func @_mysconv_kernel(%arg0: i32, %arg1: memref<1x19x32x128xbf16, #tpu.memory_space<vmem>>, %arg2: memref<9x128x128xbf16, #tpu.memory_space<vmem>>, %arg3: memref<1x16x16x128xf32, #tpu.memory_space<vmem>>) attributes {dimension_semantics = [#tpu.dimension_semantics<parallel>], iteration_bounds = array<i64: 2>, scalar_prefetch = 0 : i64, scratch_operands = 0 : i64, tpu.core_type = #tpu.core_type<tc>, window_params = [{transform_indices = @transform_0, window_bounds = array<i64: 1, 19, 32, 128>}, {pipeline_mode = #tpu.pipeline_mode<synchronous>, transform_indices = @transform_1, window_bounds = array<i64: 9, 128, 128>}, {transform_indices = @transform_2, window_bounds = array<i64: 1, 16, 16, 128>}]} {
    %c0 = arith.constant 0 : index
    %c0_0 = arith.constant 0 : index
    %c0_1 = arith.constant 0 : index
    %c0_2 = arith.constant 0 : index
    %0 = vector.load %arg1[%c0, %c0_0, %c0_1, %c0_2] : memref<1x19x32x128xbf16, #tpu.memory_space<vmem>>, vector<1x19x32x128xbf16>
    %1 = vector.shape_cast %0 : vector<1x19x32x128xbf16> to vector<19x32x128xbf16>
    %2 = vector.shape_cast %1 : vector<19x32x128xbf16> to vector<608x128xbf16>
    %3 = vector.extract_strided_slice %2 {offsets = [1, 0], sizes = [576, 128], strides = [1, 1]} : vector<608x128xbf16> to vector<576x128xbf16>
    %4 = vector.extract_strided_slice %2 {offsets = [2, 0], sizes = [576, 128], strides = [1, 1]} : vector<608x128xbf16> to vector<576x128xbf16>
    %5 = vector.extract_strided_slice %2 {offsets = [0, 0], sizes = [512, 128], strides = [1, 1]} : vector<608x128xbf16> to vector<512x128xbf16>
    %c0_3 = arith.constant 0 : index
    %c0_4 = arith.constant 0 : index
    %c0_5 = arith.constant 0 : index
    %6 = vector.load %arg2[%c0_3, %c0_4, %c0_5] : memref<9x128x128xbf16, #tpu.memory_space<vmem>>, vector<1x128x128xbf16>
    %7 = vector.shape_cast %6 : vector<1x128x128xbf16> to vector<128x128xbf16>
    %cst = arith.constant dense<0.000000e+00> : vector<512x128xf32>
    %8 = tpu.matmul %5, %7, %cst {dimension_numbers = #tpu.dot_dimension_numbers<[1], [0], [0], [1], [0, 0, 1, 1], [], []>} : vector<512x128xbf16>, vector<128x128xbf16>, vector<512x128xf32> -> vector<512x128xf32>
    %9 = vector.extract_strided_slice %3 {offsets = [0, 0], sizes = [512, 128], strides = [1, 1]} : vector<576x128xbf16> to vector<512x128xbf16>
    %c1 = arith.constant 1 : index
    %c0_6 = arith.constant 0 : index
    %c0_7 = arith.constant 0 : index
    %10 = vector.load %arg2[%c1, %c0_6, %c0_7] : memref<9x128x128xbf16, #tpu.memory_space<vmem>>, vector<1x128x128xbf16>
    %11 = vector.shape_cast %10 : vector<1x128x128xbf16> to vector<128x128xbf16>
    %cst_8 = arith.constant dense<0.000000e+00> : vector<512x128xf32>
    %12 = tpu.matmul %9, %11, %cst_8 {dimension_numbers = #tpu.dot_dimension_numbers<[1], [0], [0], [1], [0, 0, 1, 1], [], []>} : vector<512x128xbf16>, vector<128x128xbf16>, vector<512x128xf32> -> vector<512x128xf32>
    %13 = arith.addf %8, %12 : vector<512x128xf32>
    %14 = vector.extract_strided_slice %4 {offsets = [0, 0], sizes = [512, 128], strides = [1, 1]} : vector<576x128xbf16> to vector<512x128xbf16>
    %c2 = arith.constant 2 : index
    %c0_9 = arith.constant 0 : index
    %c0_10 = arith.constant 0 : index
    %15 = vector.load %arg2[%c2, %c0_9, %c0_10] : memref<9x128x128xbf16, #tpu.memory_space<vmem>>, vector<1x128x128xbf16>
    %16 = vector.shape_cast %15 : vector<1x128x128xbf16> to vector<128x128xbf16>
    %cst_11 = arith.constant dense<0.000000e+00> : vector<512x128xf32>
    %17 = tpu.matmul %14, %16, %cst_11 {dimension_numbers = #tpu.dot_dimension_numbers<[1], [0], [0], [1], [0, 0, 1, 1], [], []>} : vector<512x128xbf16>, vector<128x128xbf16>, vector<512x128xf32> -> vector<512x128xf32>
    %18 = arith.addf %13, %17 : vector<512x128xf32>
    %19 = vector.extract_strided_slice %2 {offsets = [32, 0], sizes = [512, 128], strides = [1, 1]} : vector<608x128xbf16> to vector<512x128xbf16>
    %c3 = arith.constant 3 : index
    %c0_12 = arith.constant 0 : index
    %c0_13 = arith.constant 0 : index
    %20 = vector.load %arg2[%c3, %c0_12, %c0_13] : memref<9x128x128xbf16, #tpu.memory_space<vmem>>, vector<1x128x128xbf16>
    %21 = vector.shape_cast %20 : vector<1x128x128xbf16> to vector<128x128xbf16>
    %cst_14 = arith.constant dense<0.000000e+00> : vector<512x128xf32>
    %22 = tpu.matmul %19, %21, %cst_14 {dimension_numbers = #tpu.dot_dimension_numbers<[1], [0], [0], [1], [0, 0, 1, 1], [], []>} : vector<512x128xbf16>, vector<128x128xbf16>, vector<512x128xf32> -> vector<512x128xf32>
    %23 = arith.addf %18, %22 : vector<512x128xf32>
    %24 = vector.extract_strided_slice %3 {offsets = [32, 0], sizes = [512, 128], strides = [1, 1]} : vector<576x128xbf16> to vector<512x128xbf16>
    %c4 = arith.constant 4 : index
    %c0_15 = arith.constant 0 : index
    %c0_16 = arith.constant 0 : index
    %25 = vector.load %arg2[%c4, %c0_15, %c0_16] : memref<9x128x128xbf16, #tpu.memory_space<vmem>>, vector<1x128x128xbf16>
    %26 = vector.shape_cast %25 : vector<1x128x128xbf16> to vector<128x128xbf16>
    %cst_17 = arith.constant dense<0.000000e+00> : vector<512x128xf32>
    %27 = tpu.matmul %24, %26, %cst_17 {dimension_numbers = #tpu.dot_dimension_numbers<[1], [0], [0], [1], [0, 0, 1, 1], [], []>} : vector<512x128xbf16>, vector<128x128xbf16>, vector<512x128xf32> -> vector<512x128xf32>
    %28 = arith.addf %23, %27 : vector<512x128xf32>
    %29 = vector.extract_strided_slice %4 {offsets = [32, 0], sizes = [512, 128], strides = [1, 1]} : vector<576x128xbf16> to vector<512x128xbf16>
    %c5 = arith.constant 5 : index
    %c0_18 = arith.constant 0 : index
    %c0_19 = arith.constant 0 : index
    %30 = vector.load %arg2[%c5, %c0_18, %c0_19] : memref<9x128x128xbf16, #tpu.memory_space<vmem>>, vector<1x128x128xbf16>
    %31 = vector.shape_cast %30 : vector<1x128x128xbf16> to vector<128x128xbf16>
    %cst_20 = arith.constant dense<0.000000e+00> : vector<512x128xf32>
    %32 = tpu.matmul %29, %31, %cst_20 {dimension_numbers = #tpu.dot_dimension_numbers<[1], [0], [0], [1], [0, 0, 1, 1], [], []>} : vector<512x128xbf16>, vector<128x128xbf16>, vector<512x128xf32> -> vector<512x128xf32>
    %33 = arith.addf %28, %32 : vector<512x128xf32>
    %34 = vector.extract_strided_slice %2 {offsets = [64, 0], sizes = [512, 128], strides = [1, 1]} : vector<608x128xbf16> to vector<512x128xbf16>
    %c6 = arith.constant 6 : index
    %c0_21 = arith.constant 0 : index
    %c0_22 = arith.constant 0 : index
    %35 = vector.load %arg2[%c6, %c0_21, %c0_22] : memref<9x128x128xbf16, #tpu.memory_space<vmem>>, vector<1x128x128xbf16>
    %36 = vector.shape_cast %35 : vector<1x128x128xbf16> to vector<128x128xbf16>
    %cst_23 = arith.constant dense<0.000000e+00> : vector<512x128xf32>
    %37 = tpu.matmul %34, %36, %cst_23 {dimension_numbers = #tpu.dot_dimension_numbers<[1], [0], [0], [1], [0, 0, 1, 1], [], []>} : vector<512x128xbf16>, vector<128x128xbf16>, vector<512x128xf32> -> vector<512x128xf32>
    %38 = arith.addf %33, %37 : vector<512x128xf32>
    %39 = vector.extract_strided_slice %3 {offsets = [64, 0], sizes = [512, 128], strides = [1, 1]} : vector<576x128xbf16> to vector<512x128xbf16>
    %c7 = arith.constant 7 : index
    %c0_24 = arith.constant 0 : index
    %c0_25 = arith.constant 0 : index
    %40 = vector.load %arg2[%c7, %c0_24, %c0_25] : memref<9x128x128xbf16, #tpu.memory_space<vmem>>, vector<1x128x128xbf16>
    %41 = vector.shape_cast %40 : vector<1x128x128xbf16> to vector<128x128xbf16>
    %cst_26 = arith.constant dense<0.000000e+00> : vector<512x128xf32>
    %42 = tpu.matmul %39, %41, %cst_26 {dimension_numbers = #tpu.dot_dimension_numbers<[1], [0], [0], [1], [0, 0, 1, 1], [], []>} : vector<512x128xbf16>, vector<128x128xbf16>, vector<512x128xf32> -> vector<512x128xf32>
    %43 = arith.addf %38, %42 : vector<512x128xf32>
    %44 = vector.extract_strided_slice %4 {offsets = [64, 0], sizes = [512, 128], strides = [1, 1]} : vector<576x128xbf16> to vector<512x128xbf16>
    %c8 = arith.constant 8 : index
    %c0_27 = arith.constant 0 : index
    %c0_28 = arith.constant 0 : index
    %45 = vector.load %arg2[%c8, %c0_27, %c0_28] : memref<9x128x128xbf16, #tpu.memory_space<vmem>>, vector<1x128x128xbf16>
    %46 = vector.shape_cast %45 : vector<1x128x128xbf16> to vector<128x128xbf16>
    %cst_29 = arith.constant dense<0.000000e+00> : vector<512x128xf32>
    %47 = tpu.matmul %44, %46, %cst_29 {dimension_numbers = #tpu.dot_dimension_numbers<[1], [0], [0], [1], [0, 0, 1, 1], [], []>} : vector<512x128xbf16>, vector<128x128xbf16>, vector<512x128xf32> -> vector<512x128xf32>
    %48 = arith.addf %43, %47 : vector<512x128xf32>
    %49 = vector.shape_cast %48 : vector<512x128xf32> to vector<16x32x128xf32>
    %50 = vector.extract_strided_slice %49 {offsets = [0, 0, 0], sizes = [16, 16, 128], strides = [1, 1, 1]} : vector<16x32x128xf32> to vector<16x16x128xf32>
    %51 = vector.shape_cast %50 : vector<16x16x128xf32> to vector<256x128xf32>
    %cst_30 = arith.constant dense<0.000000e+00> : vector<128xf32>
    %52 = vector.multi_reduction <add>, %51, %cst_30 [0] : vector<256x128xf32> to vector<128xf32>
    %53 = vector.shape_cast %52 : vector<128xf32> to vector<1x128xf32>
    %cst_31 = arith.constant 3.906250e-03 : f32
    %54 = vector.broadcast %cst_31 : f32 to vector<1x128xf32>
    %55 = arith.mulf %53, %54 : vector<1x128xf32>
    %56 = vector.broadcast %55 : vector<1x128xf32> to vector<256x128xf32>
    %57 = arith.subf %51, %56 : vector<256x128xf32>
    %58 = arith.mulf %57, %57 : vector<256x128xf32>
    %cst_32 = arith.constant dense<0.000000e+00> : vector<128xf32>
    %59 = vector.multi_reduction <add>, %58, %cst_32 [0] : vector<256x128xf32> to vector<128xf32>
    %60 = vector.shape_cast %59 : vector<128xf32> to vector<1x128xf32>
    %cst_33 = arith.constant 3.906250e-03 : f32
    %61 = vector.broadcast %cst_33 : f32 to vector<1x128xf32>
    %62 = arith.mulf %60, %61 : vector<1x128xf32>
    %cst_34 = arith.constant 9.99999974E-6 : f32
    %63 = vector.broadcast %cst_34 : f32 to vector<1x128xf32>
    %64 = arith.addf %62, %63 : vector<1x128xf32>
    %65 = math.rsqrt %64 : vector<1x128xf32>
    %66 = vector.broadcast %65 : vector<1x128xf32> to vector<256x128xf32>
    %67 = arith.mulf %57, %66 : vector<256x128xf32>
    %cst_35 = arith.constant 0.000000e+00 : f32
    %68 = vector.broadcast %cst_35 : f32 to vector<256x128xf32>
    %69 = arith.maximumf %67, %68 : vector<256x128xf32>
    %70 = vector.shape_cast %69 : vector<256x128xf32> to vector<1x16x16x128xf32>
    %c0_36 = arith.constant 0 : index
    %c0_37 = arith.constant 0 : index
    %c0_38 = arith.constant 0 : index
    %c0_39 = arith.constant 0 : index
    %71 = vector.load %arg3[%c0_36, %c0_37, %c0_38, %c0_39] : memref<1x16x16x128xf32, #tpu.memory_space<vmem>>, vector<1x16x16x128xf32>
    tpu.vector_store %arg3[%c0_36, %c0_37, %c0_38, %c0_39], %70 {strides = array<i32>} : memref<1x16x16x128xf32, #tpu.memory_space<vmem>>, vector<1x16x16x128xf32>,
    return
  }
  func.func @transform_0(%arg0: i32) -> (i32, i32, i32, i32) {
    %c0_i32 = arith.constant 0 : i32
    %c0_i32_0 = arith.constant 0 : i32
    %c0_i32_1 = arith.constant 0 : i32
    %c0_i32_2 = arith.constant 0 : i32
    return %arg0, %c0_i32, %c0_i32_0, %c0_i32_1 : i32, i32, i32, i32
  }
  func.func @transform_1(%arg0: i32) -> (i32, i32, i32) {
    %c0_i32 = arith.constant 0 : i32
    %c0_i32_0 = arith.constant 0 : i32
    %c0_i32_1 = arith.constant 0 : i32
    %c0_i32_2 = arith.constant 0 : i32
    return %c0_i32, %c0_i32_0, %c0_i32_1 : i32, i32, i32
  }
  func.func @transform_2(%arg0: i32) -> (i32, i32, i32, i32) {
    %c0_i32 = arith.constant 0 : i32
    %c0_i32_0 = arith.constant 0 : i32
    %c0_i32_1 = arith.constant 0 : i32
    %c0_i32_2 = arith.constant 0 : i32
    return %arg0, %c0_i32, %c0_i32_0, %c0_i32_1 : i32, i32, i32, i32
  }
}

</mosaic_0001>

<bundles_post_ra>
// kernel: tpu_custom_call.1
= control target key start
LH: loop header
LB: loop body
LE: loop exit
PB: predicated region body
PF: predicated region fallthrough
CT: control target
= control target key end

     0   :  { %7 = vsyncpa [#allocation3], 0  ;;  %s7802_s0 = inlined_call_operand.hbm [shape: bf16[2,19,32,128], index: 0, kind: input, shape index: {}]   ;;  %s7803_s1 = inlined_call_operand.hbm [shape: bf16[9,128,128], index: 1, kind: input, shape index: {}]   ;;  %s7804_s2 = inlined_call_operand.hbm [shape: f32[2,16,16,128], index: 2, kind: output, shape index: {}]  }
   0x1   :  { %9 = vsyncpa [#allocation3 + $0x1], 0 }
   0x2   :  { %10 = vsyncpa [#allocation6], 0 }
   0x3   :  { %11 = vsyncpa [#allocation4], 0 }
   0x4   :  { %13 = vsyncpa [#allocation4 + $0x1], 0  ;;  %s6448_s9 = smov 0   ;;  %s6450_s10 = smov 0  }
   0x5   :  { %s6452_s11 = smov 0   ;;  %s6454_s12 = smov 0  }
   0x6 LB: > { %s6469_s13 = sadd.s32 4294967295, %s6424_s12   ;;  %s4385_s14 = sadd.s32 4294967294, %s6424_s12   ;;  %s6424_s12 = sphi %s6454_s12, %s7980_s12   ;;  %s6420_s11 = sphi %s6452_s11, %s7979_s11   ;;  %s6416_s10 = sphi %s6450_s10, %s7978_s10   ;;  %s6412_s9 = sphi %s6448_s9, %s7977_s9  }
   0x7   : > { %p39_p0 = scmp.ne.s32.totalorder %s6416_s10, %s6412_s9  ;;  %p7805_p1 = scmp.eq.s32.totalorder %s6469_s13, 0 }
   0x8   : > { %p90_p3 = scmp.eq.s32.totalorder %s4385_s14, 1  ;;  %p4386_p5 = scmp.ge.s32.totalorder %s6424_s12, 1 }
   0x9   : > { %p6478_p4 = por %p7805_p1, %p39_p0  ;;  %p97_p7 = scmp.lt.s32.totalorder %s6424_s12, 3 }
   0xa   : > { %p6483_p6 = por %p90_p3, %p39_p0  ;;  %s6426_s18 = smov [#allocation5]  }
   0xb   : > { %s7874_s15 = scalar_select %p6478_p4, 1, 0 }
   0xc   : > { %s7875_s16 = scalar_select %p6483_p6, 1, 0 }
   0xd   : > { %p6488_p8 = pnand %p4386_p5, %p97_p7  ;;  %s109_s19 = sshll.u32 %s6426_s18, 4  ;;  %s6492_s19 = int_to_ptr.vmem [resolvable:$true] %s109_s19 }
   0xe   : > { %s6504_s21 = sadd.s32 1, %s6424_s12   ;;  %s26_s22 = sadd.s32 1, %s6420_s11 }
   0xf   : > { %s7876_s17 = scalar_select %p6488_p8, 1, 0 }
  0x10   : > { %p6097_p9 = pneg %p6488_p8  ;;  %s23_s23 = ssub.s32 %s6424_s12, %s6504_s21 }
  0x11   : > { %s6296_s26 = scalar_lea.hbm %s7803_s1, 9216 }
  0x12   : > { %p6499_p11 = pnand %p6097_p9, %p7805_p1  ;;  %p6297_p12 = scmp.ne.s32.totalorder %s7803_s1, %s6296_s26 }
  0x13   : > { %p6303_p5 = scmp.lt.u32.totalorder %s6296_s26, %s7803_s1 }
  0x14   : > { %p6298_p13 = pneg %p6499_p11 }
  0x16   : > { %p6299_p0 = pnand %p6298_p13, %p6297_p12 }
  0x18   : > { %p6300_p3 = pneg %p6299_p0 }
  0x1a   : > { %p6305_p7 = pnand %p6303_p5, %p6300_p3 }
  0x1c   : > { %6308 = shalt.err (!%p6305_p7)
}
  0x1d   : > { %s6309_s3 = scalar_lea.vmem %s6492_s19, 9216  ;;  %p6317_p2 = scmp.lt.s32.totalorder %s6492_s19, %s6492_s19 }
  0x1e   : > { %p6310_p9 = scmp.ne.s32.totalorder %s6492_s19, %s6309_s3  ;;  %p6318_p6 = scmp.lt.s32.totalorder %s6309_s3, %s6309_s3 }
  0x20   : > { %p6312_p10 = pnand %p6310_p9, %p6298_p13  ;;  %p6319_p4 = por %p6318_p6, %p6317_p2 }
  0x22   : > { %p6313_p1 = pneg %p6312_p10 }
  0x24   : > { %p6320_p8 = pnand %p6319_p4, %p6313_p1 }
  0x26   : > { %6323 = shalt.err (!%p6320_p8)
}
  0x27   : > { %s6427_s4 = smov 64   ;;  %s6428_s5 = smov 4  }
  0x28   : > { %6100 = dma.hbm_to_vmem [thread:$0]  (!%p6499_p11), %s7803_s1, 9216, %s6492_s19, [#allocation6], %s6427_s4, %s6427_s4, %s6428_s5  }
  0x29   : > { %p24_p1 = scmp.eq.s32.totalorder %s23_s23, 0  ;;  %p33_p2 = scmp.ne.s32.totalorder %s6420_s11, %s6416_s10 }
  0x2a   : > { %p34_p4 = scmp.eq.s32.totalorder %s6424_s12, 0  ;;  %p6110_p6 = scmp.lt.s32.totalorder %s6424_s12, 2 }
  0x2b   : > { %s6538_s8 = scalar_select %p24_p1, %s6420_s11, %s26_s22  }
  0x2c   : > { %p35_p8 = por %p34_p4, %p33_p2  ;;  %p7878_p10 = scmp.eq.s32.totalorder %s6469_s13, 1 }
  0x2d   : > { %s123_s18 = sand.u32 1, %s6420_s11   ;;  %s6087_s20 = smul.u32 4864, %s6424_s12 }
  0x2e   : > { %p6542_p12 = por %p7878_p10, %p33_p2  ;;  %s6086_s24 = smul.u32 304, %s123_s18 }
  0x2f   : > { %p6548_p13 = pnand %p6110_p6, %p35_p8  ;;  %s6555_s22 = scalar_lea.hbm %s7802_s0, %s6087_s20 }
  0x30   : > { %s127_s26 = scalar_lea.vmem [#allocation2], %s6086_s24  ;;  %s6559_s28 = scalar_lea.sflag [#allocation3], %s123_s18 }
  0x31   : > { %s134_s27 = sshll.u32 %s127_s26, 4  ;;  %s6324_s29 = scalar_lea.hbm %s6555_s22, 4864  ;;  %s6557_s27 = int_to_ptr.vmem [resolvable:$true] %s134_s27 }
  0x32   : > { %p6325_p11 = scmp.ne.s32.totalorder %s6555_s22, %s6324_s29  ;;  %p6326_p0 = pneg %p6548_p13 }
  0x33   : > { %s6329_s6 = scalar_lea.hbm %s7802_s0, 9728  ;;  %p6330_p7 = scmp.lt.u32.totalorder %s6555_s22, %s7802_s0 }
  0x34   : > { %p6327_p3 = pnand %p6326_p0, %p6325_p11  ;;  %p6331_p9 = scmp.lt.u32.totalorder %s6329_s6, %s6324_s29 }
  0x35   : > { %p6333_p2 = scmp.lt.u32.totalorder %s6324_s29, %s6555_s22 }
  0x36   : > { %p6328_p5 = pneg %p6327_p3  ;;  %p6332_p1 = por %p6331_p9, %p6330_p7 }
  0x38   : > { %p6334_p4 = por %p6333_p2, %p6332_p1 }
  0x3a   : > { %p6335_p6 = pnand %p6334_p4, %p6328_p5 }
  0x3c   : > { %6338 = shalt.err (!%p6335_p6)
}
  0x3d   : > { %s6339_s18 = scalar_lea.vmem %s6557_s27, 4864  ;;  %s6429_s24 = smov [#allocation2]  }
  0x3e   : > { %p6340_p8 = scmp.ne.s32.totalorder %s6557_s27, %s6339_s18  ;;  %s6344_s19 = sshll.u32 %s6429_s24, 4  ;;  %s6345_s19 = int_to_ptr.vmem [resolvable:$false] %s6344_s19 }
  0x3f   : > { %s6346_s23 = scalar_lea.vmem %s6345_s19, 9728  ;;  %p6347_p3 = scmp.lt.s32.totalorder %s6557_s27, %s6345_s19 }
  0x40   : > { %p6342_p10 = pnand %p6340_p8, %p6326_p0  ;;  %p6348_p7 = scmp.lt.s32.totalorder %s6346_s23, %s6339_s18 }
  0x42   : > { %p6343_p11 = pneg %p6342_p10  ;;  %p6349_p9 = por %p6348_p7, %p6347_p3 }
  0x44   : > { %p6350_p1 = pnand %p6349_p9, %p6343_p11 }
  0x46   : > { %6353 = shalt.err (!%p6350_p1)
}
  0x47   : > { %6104 = dma.hbm_to_vmem [thread:$0]  (!%p6548_p13), %s6555_s22, 4864, %s6557_s27, %s6559_s28, %s6427_s4, %s6427_s4, %s6428_s5  }
  0x48   : > { %p7881_p0 = scmp.ne.s32.totalorder %s7876_s17, 0 }
  0x4a   : > { %146 = sbr.rel (%p7881_p0) target bundleno = 1060 (0x424), region = 28 }
  0x51   : > { %s6593_s26 = sand.u32 1, %s6416_s10   ;;  %p7882_p5 = scmp.ne.s32.totalorder %s7874_s15, 0 }
  0x52   : > { %s6088_s29 = smul.u32 304, %s6593_s26  ;;  %s149_s30 = scalar_lea.sflag [#allocation3], %s6593_s26 }
  0x54   : > { %s6597_s3 = scalar_lea.vmem [#allocation2], %s6088_s29 }
  0x55   : > { %6399 = dma.done.wait (%p7882_p5), %s149_s30, 4864  }
  0x56   : > { %6401 = vsyncadd (%p7882_p5), %s149_s30, 4294962432  ;;  %p7883_p13 = scmp.eq.s32.totalorder %s6469_s13, 0 }
  0x58   : > { %6403 = dma.done.wait (%p7883_p13), [#allocation6], 9216   ;;  %p7884_p2 = pmov %p7883_p13 }
  0x59   : > { %v6150_v0 = vld [vmem:[#allocation5 + $0x40] sm:$0xff]   ;;  %v6152_v2 = vld [vmem:[#allocation5 + $0x48] sm:$0xff]   ;;  %v6154_v4 = vld [vmem:[#allocation5 + $0x50] sm:$0xff]   ;;  %vm447_vm0 = vsmask.f32 7424  ;;  %vm1399_vm1 = vcmask 1046528  }
  0x5a   : > { %6405 = vsyncadd (%p7884_p2), [#allocation6], 4294958080  ;;  %v6151_v1 = vld [vmem:[#allocation5 + $0x100] sm:$0xff]   ;;  %4870 = vmatprep.subr.bf16.mxu1 %v6150_v0  ;;  %v6153_v3 = vld [vmem:[#allocation5 + $0x108] sm:$0xff]   ;;  %s4392_s15 = sshll.u32 %s6593_s26, 8  ;;  %s4509_s4 = sshll.u32 %s6469_s13, 12 }
  0x5b   : > { %5190 = vmatprep.subr.bf16.mxu0 %v6151_v1  ;;  %4871 = vmatpush3.bf16.msra.mxu1 %v6150_v0  ;;  %v6155_v5 = vld [vmem:[#allocation5 + $0x110] sm:$0xff]   ;;  %v6156_v6 = vld [vmem:[#allocation5 + $0x58] sm:$0xff]   ;;  %v6158_v8 = vld [vmem:[#allocation5 + $0x60] sm:$0xff]   ;;  %s7664_s17 = scalar_lea.vmem [#allocation7], %s4392_s15  ;;  %s7740_s22 = scalar_lea.hbm %s7804_s2, %s4509_s4 }
  0x5c   : > { %5191 = vmatpush3.bf16.msra.mxu0 %v6151_v1  ;;  %4872 = vmatprep.subr.bf16.mxu1 %v6152_v2  ;;  %v6157_v7 = vld [vmem:[#allocation5 + $0x118] sm:$0xff]   ;;  %v6159_v9 = vld [vmem:[#allocation5 + $0x120] sm:$0xff]   ;;  %v6160_v10 = vld [vmem:[#allocation5 + $0x68] sm:$0xff]   ;;  %s4302_s5 = sshll.u32 %s7664_s17, 4  ;;  %s4289_s27 = scalar_lea.sflag [#allocation4], %s6593_s26  ;;  %s7742_s5 = int_to_ptr.vmem [resolvable:$true] %s4302_s5 }
  0x5d   : > { %5192 = vmatprep.subr.bf16.mxu0 %v6153_v3  ;;  %v6161_v11 = vld [vmem:[#allocation5 + $0x128] sm:$0xff]   ;;  %v6166_v12 = vld [vmem:[%s6597_s3] sm:$0xff]   ;;  %v6610_v18 = vld [vmem:[%s6597_s3 + $0x10] sm:$0xff]   ;;  %s6354_s28 = scalar_lea.vmem %s7742_s5, 4096  ;;  %s6430_s6 = smov [#allocation7]  }
  0x5e   : > { %v6167_v13 = vld [vmem:[%s6597_s3 + $0x8] sm:$0xff]   ;;  %v6162_v14 = vld [vmem:[#allocation5 + $0x70] sm:$0xff]   ;;  %v449_v15 = vshrl.u32 %v6166_v12, 16  ;;  %v451_v16 = vshll.u32 %v6166_v12, 16  ;;  %v6613_v19 = vld [vmem:[%s6597_s3 + $0x18] sm:$0xff]   ;;  %v464_v23 = vshll.u32 %v6610_v18, 16  ;;  %p6355_p4 = scmp.ne.s32.totalorder %s7742_s5, %s6354_s28 }
  0x5f   : > { %4873 = vmatpush3.bf16.msra.mxu1 %v6152_v2  ;;  %v456_v17 = vshll.u32 %v6167_v13, 16  ;;  %v6163_v20 = vld [vmem:[#allocation5 + $0x130] sm:$0xff]   ;;  %v468_v24 = vshrl.u32 %v6610_v18, 16  ;;  %v6164_v26 = vld [vmem:[#allocation5 + $0x78] sm:$0xff]   ;;  %v472_v27 = vshll.u32 %v6613_v19, 16  ;;  %v460_v28 = vshrl.u32 %v6167_v13, 16 }
  0x60   : > { %5193 = vmatpush3.bf16.msra.mxu0 %v6153_v3  ;;  %4874 = vmatprep.subr.bf16.mxu1 %v6154_v4  ;;  %v453_v21 = vrot.slane %v451_v16, 1  ;;  %v6618_v25 = vld [vmem:[%s6597_s3 + $0x20] sm:$0xff]   ;;  %v6165_v29 = vld [vmem:[#allocation5 + $0x138] sm:$0xff]   ;;  %v466_v31 = vrot.slane %v464_v23, 1  ;;  %v476_v32 = vshrl.u32 %v6613_v19, 16  ;;  %v6631_v42 = vld [vmem:[%s6597_s3 + $0x30] sm:$0xff]   ;;  %p6356_p6 = pnand %p6355_p4, %p6542_p12 }
  0x61   : > { %5194 = vmatprep.subr.bf16.mxu0 %v6155_v5  ;;  %v458_v22 = vrot.slane %v456_v17, 1  ;;  %v474_v33 = vrot.slane %v472_v27, 1  ;;  %v480_v34 = vshll.u32 %v6618_v25, 16  ;;  %v6625_v37 = vld [vmem:[%s6597_s3 + $0x28] sm:$0xff]   ;;  %v484_v38 = vshrl.u32 %v6618_v25, 16  ;;  %v6170_v43 = vld [vmem:[#allocation5] sm:$0xff]  }
  0x62   : > { %v454_v30 = vor.u32 %v453_v21, %v449_v15  ;;  %v470_v36 = vor.u32 %v468_v24, %v466_v31  ;;  %v488_v41 = vshll.u32 %v6625_v37, 16  ;;  %v6172_v46 = vld [vmem:[#allocation5 + $0x140] sm:$0xff]   ;;  %v6634_v47 = vld [vmem:[%s6597_s3 + $0x38] sm:$0xff]   ;;  %v496_v51 = vshll.u32 %v6631_v42, 16  ;;  %v6179_v62 = vld [vmem:[#allocation5 + $0x150] sm:$0xff]   ;;  %p6357_p8 = pneg %p6356_p6  ;;  %s6358_s7 = sshll.u32 %s6430_s6, 4  ;;  %s6359_s7 = int_to_ptr.vmem [resolvable:$false] %s6358_s7 }
  0x63   : > { %4875 = vmatpush3.bf16.msra.mxu1 %v6154_v4  ;;  %v462_v40 = vor.u32 %v460_v28, %v458_v22  ;;  %v478_v44 = vor.u32 %v476_v32, %v474_v33  ;;  %v482_v45 = vrot.slane %v480_v34, 1  ;;  %v492_v53 = vshrl.u32 %v6625_v37, 16  ;;  %v6175_v54 = vld [vmem:[#allocation5 + $0x148] sm:$0xff]   ;;  %v6646_v60 = vld [vmem:[%s6597_s3 + $0x40] sm:$0xff]   ;;  %v6191_v17 = vld [vmem:[#allocation5 + $0x18] sm:$0xff]   ;;  %s6360_s20 = scalar_lea.vmem %s6359_s7, 8192  ;;  %p6361_p10 = scmp.lt.s32.totalorder %s7742_s5, %s6359_s7 }
  0x64   : > { %5195 = vmatpush3.bf16.msra.mxu0 %v6155_v5  ;;  %4876 = vmatprep.subr.bf16.mxu1 %v6156_v6  ;;  %v459_v35 = vsel %vm447_vm0, %v454_v30, %v458_v22  ;;  %v475_v39 = vsel %vm447_vm0, %v470_v36, %v474_v33  ;;  %v490_v49 = vrot.slane %v488_v41, 1  ;;  %v500_v55 = vshrl.u32 %v6631_v42, 16  ;;  %v6177_v58 = vld [vmem:[#allocation5 + $0x8] sm:$0xff]   ;;  %v6184_v2 = vld [vmem:[#allocation5 + $0x10] sm:$0xff]   ;;  %v6186_v16 = vld [vmem:[#allocation5 + $0x160] sm:$0xff]   ;;  %p6362_p11 = scmp.lt.s32.totalorder %s6360_s20, %s6354_s28 }
  0x65   : > { %5196 = vmatprep.subr.bf16.mxu0 %v6157_v7  ;;  %4886 = vmatprep.mubr.bf16.mxu1 %v459_v35  ;;  %v486_v48 = vor.u32 %v484_v38, %v482_v45  ;;  %v467_v50 = vsel %vm447_vm0, %v462_v40, %v466_v31  ;;  %v483_v52 = vsel %vm447_vm0, %v478_v44, %v482_v45  ;;  %v504_v56 = vshll.u32 %v6634_v47, 16  ;;  %v6650_v1 = vld [vmem:[%s6597_s3 + $0x48] sm:$0xff]   ;;  %v6669_v13 = vld [vmem:[%s6597_s3 + $0x58] sm:$0xff]   ;;  %v6197_v30 = vld [vmem:[#allocation5 + $0x20] sm:$0xff]  }
  0x66   : > { %5206 = vmatprep.mubr.bf16.mxu0 %v475_v39  ;;  %v498_v59 = vrot.slane %v496_v51, 1  ;;  %v494_v61 = vor.u32 %v492_v53, %v490_v49  ;;  %v512_v3 = vshll.u32 %v6646_v60, 16  ;;  %v508_v5 = vshrl.u32 %v6634_v47, 16  ;;  %v6189_v27 = vld [vmem:[#allocation5 + $0x168] sm:$0xff]   ;;  %v6193_v35 = vld [vmem:[#allocation5 + $0x170] sm:$0xff]   ;;  %v6196_v44 = vld [vmem:[#allocation5 + $0x178] sm:$0xff]   ;;  %p6363_p3 = por %p6362_p11, %p6361_p10 }
  0x67   : > { %4877 = vmatpush3.bf16.msra.mxu1 %v6156_v6  ;;  %v6643_v57 = vsel %vm447_vm0, %v486_v48, %v490_v49  ;;  %v506_v0 = vrot.slane %v504_v56, 1  ;;  %v516_v6 = vshrl.u32 %v6646_v60, 16  ;;  %v524_v22 = vshrl.u32 %v6650_v1, 16  ;;  %v6689_v32 = vld [vmem:[%s6597_s3 + $0x68] sm:$0xff]   ;;  %v6703_v45 = vld [vmem:[%s6597_s3 + $0x70] sm:$0xff]  }
  0x68   : > { %5197 = vmatpush3.bf16.msra.mxu0 %v6157_v7  ;;  %4878 = vmatprep.subr.bf16.mxu1 %v6158_v8  ;;  %v502_v63 = vor.u32 %v500_v55, %v498_v59  ;;  %v6654_v4 = vsel %vm447_vm0, %v494_v61, %v498_v59  ;;  %v6203_v48 = vld [vmem:[#allocation5 + $0x28] sm:$0xff]   ;;  %v6711_v53 = vld [vmem:[#allocation5 + $0x180] sm:$0xff]   ;;  %v556_v56 = vshrl.u32 %v6689_v32, 16  ;;  %v564_v59 = vshrl.u32 %v6703_v45, 16  ;;  %p6364_p7 = pnand %p6363_p3, %p6357_p8 }
  0x69   : > { %5198 = vmatprep.subr.bf16.mxu0 %v6159_v9  ;;  %v510_v12 = vor.u32 %v508_v5, %v506_v0 }
  0x6a   : > { %v6659_v7 = vsel %vm447_vm0, %v502_v63, %v506_v0  ;;  %v6728_v0 = vld [vmem:[%s6597_s3 + $0x80] sm:$0xff]  }
  0x6b   : > { %4879 = vmatpush3.bf16.msra.mxu1 %v6158_v8  ;;  %v520_v8 = vshll.u32 %v6650_v1, 16 }
  0x6c   : > { %5199 = vmatpush3.bf16.msra.mxu0 %v6159_v9  ;;  %4880 = vmatprep.subr.bf16.mxu1 %v6160_v10  ;;  %v6182_v9 = vld [vmem:[#allocation5 + $0x158] sm:$0xff]  }
  0x6d   : > { %5200 = vmatprep.subr.bf16.mxu0 %v6161_v11  ;;  %v522_v15 = vrot.slane %v520_v8, 1  ;;  %v576_v8 = vshll.u32 %v6728_v0, 16 }
  0x6f   : > { %4881 = vmatpush3.bf16.msra.mxu1 %v6160_v10  ;;  %v514_v10 = vrot.slane %v512_v3, 1  ;;  %v526_v31 = vor.u32 %v524_v22, %v522_v15  ;;  %v6749_v22 = vld [vmem:[%s6597_s3 + $0x90] sm:$0xff]  }
  0x70   : > { %5201 = vmatpush3.bf16.msra.mxu0 %v6161_v11  ;;  %4882 = vmatprep.subr.bf16.mxu1 %v6162_v14  ;;  %v6665_v11 = vld [vmem:[%s6597_s3 + $0x50] sm:$0xff]  }
  0x71   : > { %5202 = vmatprep.subr.bf16.mxu0 %v6163_v20  ;;  %v6673_v21 = vsel %vm447_vm0, %v510_v12, %v514_v10  ;;  %v532_v23 = vshrl.u32 %v6665_v11, 16 }
  0x72   : > { %7885 = vst [vmem:[#allocation11_spill] sm:$0xff] %v6673_v21 }
  0x73   : > { %4883 = vmatpush3.bf16.msra.mxu1 %v6162_v14  ;;  %v518_v14 = vor.u32 %v516_v6, %v514_v10  ;;  %v6732_v6 = vld [vmem:[%s6597_s3 + $0x88] sm:$0xff]  }
  0x74   : > { %5203 = vmatpush3.bf16.msra.mxu0 %v6163_v20  ;;  %4884 = vmatprep.subr.bf16.mxu1 %v6164_v26  ;;  %v528_v20 = vshll.u32 %v6665_v11, 16 }
  0x75   : > { %5204 = vmatprep.subr.bf16.mxu0 %v6165_v29  ;;  %v6678_v24 = vsel %vm447_vm0, %v518_v14, %v522_v15  ;;  %v580_v14 = vshrl.u32 %v6728_v0, 16  ;;  %v584_v15 = vshll.u32 %v6732_v6, 16 }
  0x76   : > { %7886 = vst [vmem:[#allocation12_spill] sm:$0xff] %v6678_v24  ;;  %v530_v28 = vrot.slane %v528_v20, 1 }
  0x77   : > { %4885 = vmatpush3.bf16.msra.mxu1 %v6164_v26  ;;  %v536_v26 = vshll.u32 %v6669_v13, 16 }
  0x78   : > { %5205 = vmatpush3.bf16.msra.mxu0 %v6165_v29  ;;  %4950 = vmatprep.subr.bf16.mxu1 %v6170_v43  ;;  %v6685_v29 = vld [vmem:[%s6597_s3 + $0x60] sm:$0xff]   ;;  %v534_v33 = vor.u32 %v532_v23, %v530_v28  ;;  %v6693_v38 = vsel %vm447_vm0, %v526_v31, %v530_v28  ;;  %v6754_v28 = vld [vmem:[%s6597_s3 + $0x98] sm:$0xff]   ;;  %v588_v31 = vshrl.u32 %v6732_v6, 16 }
  0x79   : > { %5270 = vmatprep.subr.bf16.mxu0 %v6172_v46  ;;  %v538_v34 = vrot.slane %v536_v26, 1  ;;  %v544_v36 = vshll.u32 %v6685_v29, 16  ;;  %7887 = vst [vmem:[#allocation13_spill] sm:$0xff] %v6693_v38  ;;  %v548_v41 = vshrl.u32 %v6685_v29, 16  ;;  %v586_v26 = vrot.slane %v584_v15, 1 }
  0x7a   : > { %4887 = vmatmul.mubr.bf16.vlgmr.msra.gmra.mrb[0].mxu1 %v467_v50  ;;  %v6709_v50 = vld [vmem:[%s6597_s3 + $0x78] sm:$0xff]  }
  0x7b   : > { %5207 = vmatmul.mubr.bf16.vlgmr.msra.gmra.mrb[0].mxu0 %v483_v52  ;;  %4951 = vmatpush3.bf16.msra.mxu1 %v6170_v43  ;;  %v6697_v40 = vsel %vm447_vm0, %v534_v33, %v538_v34  ;;  %v552_v43 = vshll.u32 %v6689_v32, 16  ;;  %v568_v61 = vshll.u32 %v6709_v50, 16  ;;  %v572_v10 = vshrl.u32 %v6709_v50, 16 }
  0x7c   : > { %5271 = vmatpush3.bf16.msra.mxu0 %v6172_v46  ;;  %4890 = vmatprep.mubr.bf16.mxu1 %v475_v39  ;;  %v540_v39 = vshrl.u32 %v6669_v13, 16  ;;  %7888 = vst [vmem:[#allocation14_spill] sm:$0xff] %v6697_v40  ;;  %v546_v46 = vrot.slane %v544_v36, 1  ;;  %v592_v33 = vshll.u32 %v6749_v22, 16  ;;  %v6769_v36 = vld [vmem:[%s6597_s3 + $0xa8] sm:$0xff]  }
  0x7d   : > { %5210 = vmatprep.mubr.bf16.mxu0 %v6643_v57  ;;  %5272 = vmatprep.subr.bf16.mxu0 %v6175_v54  ;;  %v570_v5 = vrot.slane %v568_v61, 1 }
  0x7e   : > { %4952 = vmatprep.subr.bf16.mxu1 %v6177_v58  ;;  %v542_v49 = vor.u32 %v540_v39, %v538_v34  ;;  %v550_v51 = vor.u32 %v548_v41, %v546_v46  ;;  %v7808_v39 = vrot.slane %v6610_v18, 1  ;;  %v1405_v41 = vrot.slane %v6613_v19, 1 }
  0x7f   : > { %4953 = vmatpush3.bf16.msra.mxu1 %v6177_v58  ;;  %v574_v20 = vor.u32 %v572_v10, %v570_v5  ;;  %v616_v19 = vshll.u32 %v6769_v36, 16  ;;  %v1415_v10 = vrot.slane %v6646_v60, 1 }
  0x80   : > { %5273 = vmatpush3.bf16.msra.mxu0 %v6175_v54  ;;  %4954 = vmatprep.subr.bf16.mxu1 %v6184_v2  ;;  %v560_v54 = vshll.u32 %v6703_v45, 16  ;;  %v6715_v55 = vsel %vm447_vm0, %v542_v49, %v546_v46  ;;  %v6779_v46 = vld [vmem:[%s6597_s3 + $0xb0] sm:$0xff]   ;;  %v594_v49 = vrot.slane %v592_v33, 1 }
  0x81   : > { %5274 = vmatprep.subr.bf16.mxu0 %v6179_v62  ;;  %7889 = vst [vmem:[#allocation15_spill] sm:$0xff] %v6715_v55  ;;  %v628_v15 = vshrl.u32 %v6779_v46, 16 }
  0x82   : > { %4891 = vmatmul.mubr.bf16.gmra.mrb[4].mxu1 %v483_v52  ;;  %v554_v52 = vrot.slane %v552_v43, 1  ;;  %v562_v63 = vrot.slane %v560_v54, 1  ;;  %v600_v43 = vshll.u32 %v6754_v28, 16 }
  0x83   : > { %5211 = vmatmul.mubr.bf16.gmra.mrb[4].mxu0 %v6654_v4  ;;  %4894 = vmatprep.mubr.bf16.mxu1 %v6643_v57 }
  0x84   : > { %5214 = vmatprep.mubr.bf16.mxu0 %v6659_v7  ;;  %5275 = vmatpush3.bf16.msra.mxu0 %v6179_v62  ;;  %v6719_v58 = vsel %vm447_vm0, %v550_v51, %v554_v52  ;;  %v6209_v62 = vld [vmem:[#allocation5 + $0x30] sm:$0xff]   ;;  %v566_v3 = vor.u32 %v564_v59, %v562_v63  ;;  %v596_v51 = vshrl.u32 %v6749_v22, 16  ;;  %v602_v54 = vrot.slane %v600_v43, 1 }
  0x85   : > { %5276 = vmatprep.subr.bf16.mxu0 %v6182_v9  ;;  %4955 = vmatpush3.bf16.msra.mxu1 %v6184_v2  ;;  %7890 = vst [vmem:[#allocation16_spill] sm:$0xff] %v6719_v58  ;;  %v558_v2 = vor.u32 %v556_v56, %v554_v52  ;;  %v1409_v56 = vrot.slane %v6625_v37, 1  ;;  %v604_v59 = vshrl.u32 %v6754_v28, 16  ;;  %v6800_v37 = vld [vmem:[%s6597_s3 + $0xb8] sm:$0xff]  }
  0x86   : > { %4956 = vmatprep.subr.bf16.mxu1 %v6191_v17  ;;  %v6740_v12 = vsel %vm447_vm0, %v566_v3, %v570_v5  ;;  %v1413_v3 = vrot.slane %v6634_v47, 1  ;;  %v598_v47 = vor.u32 %v596_v51, %v594_v49 }
  0x87   : > { %7892 = vst [vmem:[#allocation18_spill] sm:$0xff] %v6740_v12  ;;  %v606_v43 = vor.u32 %v604_v59, %v602_v54  ;;  %v6221_v59 = vld [vmem:[#allocation5 + $0x1a0] sm:$0xff]  }
  0x88   : > { %5277 = vmatpush3.bf16.msra.mxu0 %v6182_v9  ;;  %v6736_v9 = vsel %vm447_vm0, %v558_v2, %v562_v63  ;;  %v6796_v2 = vsel %vm1399_vm1, %v7808_v39, %v1405_v41  ;;  %v6817_v60 = vsel %vm447_vm0, %v598_v47, %v602_v54  ;;  %v6893_v39 = vld [vmem:[%s6597_s3 + $0xe0] sm:$0xff]  }
  0x89   : > { %5278 = vmatprep.subr.bf16.mxu0 %v6186_v16  ;;  %4957 = vmatpush3.bf16.msra.mxu1 %v6191_v17  ;;  %7891 = vst [vmem:[#allocation17_spill] sm:$0xff] %v6736_v9  ;;  %v6215_v17 = vld [vmem:[#allocation5 + $0x38] sm:$0xff]   ;;  %7896 = vst [vmem:[#allocation22_spill] sm:$0xff] %v6817_v60 }
  0x8a   : > { %4895 = vmatmul.mubr.bf16.gmra.mrb[8].mxu1 %v6654_v4  ;;  %4958 = vmatprep.subr.bf16.mxu1 %v6197_v30 }
  0x8b   : > { %5215 = vmatmul.mubr.bf16.gmra.mrb[8].mxu0 %v6673_v21  ;;  %4898 = vmatprep.mubr.bf16.mxu1 %v6659_v7 }
  0x8c   : > { %5218 = vmatprep.mubr.bf16.mxu0 %v6678_v24  ;;  %5279 = vmatpush3.bf16.msra.mxu0 %v6186_v16  ;;  %v578_v16 = vrot.slane %v576_v8, 1  ;;  %v618_v8 = vrot.slane %v616_v19, 1 }
  0x8d   : > { %5280 = vmatprep.subr.bf16.mxu0 %v6189_v27  ;;  %4959 = vmatpush3.bf16.msra.mxu1 %v6197_v30 }
  0x8e   : > { %4960 = vmatprep.subr.bf16.mxu1 %v6203_v48  ;;  %v582_v23 = vor.u32 %v580_v14, %v578_v16  ;;  %v6758_v30 = vsel %vm447_vm0, %v574_v20, %v578_v16  ;;  %v632_v16 = vshll.u32 %v6800_v37, 16  ;;  %v6204_v20 = vld [vmem:[#allocation5 + $0x188] sm:$0xff]  }
  0x8f   : > { %7893 = vst [vmem:[#allocation19_spill] sm:$0xff] %v6758_v30 }
  0x90   : > { %5281 = vmatpush3.bf16.msra.mxu0 %v6189_v27  ;;  %v6751_v27 = vld [vmem:[#allocation5 + $0x80] sm:$0xff]   ;;  %v6763_v34 = vsel %vm447_vm0, %v582_v23, %v586_v26 }
  0x91   : > { %5282 = vmatprep.subr.bf16.mxu0 %v6193_v35  ;;  %4961 = vmatpush3.bf16.msra.mxu1 %v6203_v48  ;;  %7894 = vst [vmem:[#allocation20_spill] sm:$0xff] %v6763_v34  ;;  %v590_v48 = vor.u32 %v588_v31, %v586_v26  ;;  %v1417_v31 = vrot.slane %v6650_v1, 1  ;;  %v6216_v1 = vld [vmem:[#allocation5 + $0x198] sm:$0xff]  }
  0x92   : > { %4899 = vmatmul.mubr.bf16.gmra.mrb[12].mxu1 %v6673_v21  ;;  %4962 = vmatprep.subr.bf16.mxu1 %v6209_v62  ;;  %v7106_v21 = vld [vmem:[%s6597_s3 + $0x108] sm:$0xff]  }
  0x93   : > { %5219 = vmatmul.mubr.bf16.gmra.mrb[12].mxu0 %v6693_v38  ;;  %4902 = vmatprep.mubr.bf16.mxu1 %v6678_v24  ;;  %v6791_v63 = vsel %vm447_vm0, %v590_v48, %v594_v49  ;;  %v6210_v48 = vld [vmem:[#allocation5 + $0x190] sm:$0xff]   ;;  %v7063_v24 = vld [vmem:[%s6597_s3 + $0x38] sm:$0xff]  }
  0x94   : > { %5222 = vmatprep.mubr.bf16.mxu0 %v6697_v40  ;;  %5283 = vmatpush3.bf16.msra.mxu0 %v6193_v35  ;;  %v6766_v35 = vld [vmem:[%s6597_s3 + $0xa0] sm:$0xff]   ;;  %7895 = vst [vmem:[#allocation21_spill] sm:$0xff] %v6791_v63 }
  0x95   : > { %5284 = vmatprep.subr.bf16.mxu0 %v6196_v44  ;;  %4963 = vmatpush3.bf16.msra.mxu1 %v6209_v62  ;;  %v608_v52 = vshll.u32 %v6766_v35, 16  ;;  %v612_v61 = vshrl.u32 %v6766_v35, 16  ;;  %v624_v62 = vshll.u32 %v6779_v46, 16 }
  0x96   : > { %4964 = vmatprep.subr.bf16.mxu1 %v6215_v17 }
  0x97   : > { %v610_v5 = vrot.slane %v608_v52, 1  ;;  %v626_v14 = vrot.slane %v624_v62, 1  ;;  %v6853_v62 = vsel %vm1399_vm1, %v1413_v3, %v1415_v10 }
  0x98   : > { %5285 = vmatpush3.bf16.msra.mxu0 %v6196_v44  ;;  %v1407_v44 = vrot.slane %v6618_v25, 1  ;;  %v1411_v25 = vrot.slane %v6631_v42, 1  ;;  %v620_v42 = vshrl.u32 %v6769_v36, 16 }
  0x99   : > { %5350 = vmatprep.subr.bf16.mxu0 %v6711_v53  ;;  %4965 = vmatpush3.bf16.msra.mxu1 %v6215_v17  ;;  %v6811_v17 = vld [vmem:[%s6597_s3 + $0xc0] sm:$0xff]   ;;  %v6830_v49 = vsel %vm447_vm0, %v606_v43, %v610_v5 }
  0x9a   : > { %4903 = vmatmul.mubr.bf16.gmra.mrb[16].mxu1 %v6693_v38  ;;  %5030 = vmatprep.subr.bf16.mxu1 %v6751_v27  ;;  %v6814_v23 = vsel %vm1399_vm1, %v1405_v41, %v1407_v44  ;;  %v6820_v26 = vsel %vm1399_vm1, %v1407_v44, %v1409_v56  ;;  %v640_v33 = vshll.u32 %v6811_v17, 16  ;;  %v634_v41 = vrot.slane %v632_v16, 1  ;;  %7897 = vst [vmem:[#allocation23_spill] sm:$0xff] %v6830_v49  ;;  %v6865_v16 = vld [vmem:[%s6597_s3 + $0xd0] sm:$0xff]   ;;  %v7045_v38 = vld [vmem:[%s6597_s3 + $0x28] sm:$0xff]  }
  0x9b   : > { %5223 = vmatmul.mubr.bf16.gmra.mrb[16].mxu0 %v6715_v55  ;;  %4906 = vmatprep.mubr.bf16.mxu1 %v6697_v40  ;;  %v614_v44 = vor.u32 %v612_v61, %v610_v5  ;;  %v6833_v51 = vsel %vm1399_vm1, %v1409_v56, %v1411_v25  ;;  %v6839_v19 = vsel %vm1399_vm1, %v1411_v25, %v1413_v3  ;;  %v636_v61 = vshrl.u32 %v6800_v37, 16  ;;  %v6232_v40 = vld [vmem:[#allocation5 + $0xa8] sm:$0xff]  }
  0x9c   : > { %5226 = vmatprep.mubr.bf16.mxu0 %v6719_v58  ;;  %v622_v54 = vor.u32 %v620_v42, %v618_v8  ;;  %v630_v56 = vor.u32 %v628_v15, %v626_v14  ;;  %v6861_v15 = vsel %vm1399_vm1, %v1415_v10, %v1417_v31  ;;  %v642_v47 = vrot.slane %v640_v33, 1  ;;  %v6872_v10 = vld [vmem:[%s6597_s3 + $0xd8] sm:$0xff]   ;;  %v6225_v33 = vld [vmem:[#allocation5 + $0x1b0] sm:$0xff]  }
  0x9d   : > { %v6836_v52 = vsel %vm447_vm0, %v614_v44, %v618_v8  ;;  %v644_v8 = vshrl.u32 %v6811_v17, 16  ;;  %v638_v3 = vor.u32 %v636_v61, %v634_v41  ;;  %v1421_v44 = vrot.slane %v6669_v13, 1 }
  0x9e   : > { %7898 = vst [vmem:[#allocation24_spill] sm:$0xff] %v6836_v52  ;;  %v6849_v25 = vsel %vm447_vm0, %v622_v54, %v626_v14  ;;  %v6856_v5 = vsel %vm447_vm0, %v630_v56, %v634_v41  ;;  %v6223_v14 = vld [vmem:[#allocation5 + $0x1a8] sm:$0xff]  }
  0x9f   : > { %7899 = vst [vmem:[#allocation25_spill] sm:$0xff] %v6849_v25  ;;  %7900 = vst [vmem:[#allocation26_spill] sm:$0xff] %v6856_v5  ;;  %v646_v43 = vor.u32 %v644_v8, %v642_v47  ;;  %v6877_v54 = vsel %vm447_vm0, %v638_v3, %v642_v47  ;;  %v664_v8 = vshll.u32 %v6872_v10, 16  ;;  %v6227_v47 = vld [vmem:[#allocation5 + $0x1b8] sm:$0xff]  }
  0xa0   : > { %7901 = vst [vmem:[#allocation27_spill] sm:$0xff] %v6877_v54 }
  0xa2   : > { %4907 = vmatmul.mubr.bf16.gmra.mrb[20].mxu1 %v6715_v55 }
  0xa3   : > { %5227 = vmatmul.mubr.bf16.gmra.mrb[20].mxu0 %v6736_v9  ;;  %4910 = vmatprep.mubr.bf16.mxu1 %v6719_v58  ;;  %v7027_v58 = vld [vmem:[%s6597_s3 + $0x18] sm:$0xff]  }
  0xa4   : > { %5230 = vmatprep.mubr.bf16.mxu0 %v6740_v12  ;;  %7915 = vst [vmem:[#allocation41_spill] sm:$0xff] %v7027_v58 }
  0xaa   : > { %4911 = vmatmul.mubr.bf16.gmra.mrb[24].mxu1 %v6736_v9 }
  0xab   : > { %5231 = vmatmul.mubr.bf16.gmra.mrb[24].mxu0 %v6758_v30  ;;  %4914 = vmatprep.mubr.bf16.mxu1 %v6740_v12 }
  0xac   : > { %5234 = vmatprep.mubr.bf16.mxu0 %v6763_v34 }
  0xb2   : > { %4915 = vmatmul.mubr.bf16.gmra.mrb[28].mxu1 %v6758_v30 }
  0xb3   : > { %5235 = vmatmul.mubr.bf16.gmra.mrb[28].mxu0 %v6791_v63  ;;  %4918 = vmatprep.mubr.bf16.mxu1 %v6763_v34 }
  0xb4   : > { %5286 = vmatprep.mubr.bf16.mxu0 %v6796_v2 }
  0xba   : > { %4919 = vmatmul.mubr.bf16.gmra.mrb[32].mxu1 %v6791_v63 }
  0xbb   : > { %5287 = vmatmul.mubr.bf16.vlgmr.msra.gmra.mrb[0].mxu0 %v6814_v23  ;;  %4922 = vmatprep.mubr.bf16.mxu1 %v6817_v60  ;;  %v1429_v60 = vrot.slane %v6709_v50, 1 }
  0xbc   : > { %5351 = vmatpush3.bf16.msra.mxu0 %v6711_v53  ;;  %5290 = vmatprep.mubr.bf16.mxu0 %v6820_v26  ;;  %v6843_v53 = vld [vmem:[%s6597_s3 + $0xc8] sm:$0xff]  }
  0xbd   : > { %5352 = vmatprep.subr.bf16.mxu0 %v6204_v20  ;;  %v648_v42 = vshll.u32 %v6843_v53, 16  ;;  %v652_v41 = vshrl.u32 %v6843_v53, 16 }
  0xc0   : > { %5353 = vmatpush3.bf16.msra.mxu0 %v6204_v20  ;;  %v1419_v20 = vrot.slane %v6665_v11, 1 }
  0xc1   : > { %5354 = vmatprep.subr.bf16.mxu0 %v6210_v48 }
  0xc2   : > { %4923 = vmatmul.mubr.bf16.gmra.mrb[36].mxu1 %v6830_v49  ;;  %v6881_v56 = vsel %vm1399_vm1, %v1417_v31, %v1419_v20  ;;  %v6931_v49 = vld [vmem:[%s6597_s3 + $0xf8] sm:$0xff]  }
  0xc3   : > { %5291 = vmatmul.mubr.bf16.gmra.mrb[4].mxu0 %v6833_v51  ;;  %4926 = vmatprep.mubr.bf16.mxu1 %v6836_v52 }
  0xc4   : > { %5294 = vmatprep.mubr.bf16.mxu0 %v6839_v19  ;;  %5355 = vmatpush3.bf16.msra.mxu0 %v6210_v48  ;;  %v650_v48 = vrot.slane %v648_v42, 1  ;;  %v6889_v42 = vsel %vm1399_vm1, %v1419_v20, %v1421_v44  ;;  %v6900_v20 = vld [vmem:[%s6597_s3 + $0xe8] sm:$0xff]  }
  0xc5   : > { %5356 = vmatprep.subr.bf16.mxu0 %v6216_v1  ;;  %v684_v63 = vshrl.u32 %v6900_v20, 16 }
  0xc6   : > { %v6884_v61 = vsel %vm447_vm0, %v646_v43, %v650_v48  ;;  %v654_v31 = vor.u32 %v652_v41, %v650_v48  ;;  %v1423_v43 = vrot.slane %v6685_v29, 1  ;;  %v668_v48 = vshrl.u32 %v6872_v10, 16 }
  0xc7   : > { %7902 = vst [vmem:[#allocation28_spill] sm:$0xff] %v6884_v61 }
  0xc8   : > { %5357 = vmatpush3.bf16.msra.mxu0 %v6216_v1  ;;  %v656_v1 = vshll.u32 %v6865_v16, 16  ;;  %v6911_v41 = vsel %vm1399_vm1, %v1421_v44, %v1423_v43 }
  0xc9   : > { %5358 = vmatprep.subr.bf16.mxu0 %v6221_v59 }
  0xca   : > { %4927 = vmatmul.mubr.bf16.gmra.mrb[40].mxu1 %v6849_v25  ;;  %v658_v3 = vrot.slane %v656_v1, 1  ;;  %v6903_v1 = vld [vmem:[#allocation5 + $0x1c0] sm:$0xff]   ;;  %v672_v25 = vshll.u32 %v6893_v39, 16 }
  0xcb   : > { %5295 = vmatmul.mubr.bf16.gmra.mrb[8].mxu0 %v6853_v62  ;;  %4930 = vmatprep.mubr.bf16.mxu1 %v6856_v5  ;;  %v666_v5 = vrot.slane %v664_v8, 1  ;;  %v680_v8 = vshll.u32 %v6900_v20, 16 }
  0xcc   : > { %5298 = vmatprep.mubr.bf16.mxu0 %v6861_v15  ;;  %5359 = vmatpush3.bf16.msra.mxu0 %v6221_v59  ;;  %v660_v59 = vshrl.u32 %v6865_v16, 16 }
  0xcd   : > { %5360 = vmatprep.subr.bf16.mxu0 %v6223_v14  ;;  %v670_v44 = vor.u32 %v668_v48, %v666_v5 }
  0xd0   : > { %5361 = vmatpush3.bf16.msra.mxu0 %v6223_v14  ;;  %v662_v14 = vor.u32 %v660_v59, %v658_v3 }
  0xd1   : > { %5362 = vmatprep.subr.bf16.mxu0 %v6225_v33 }
  0xd2   : > { %4931 = vmatmul.mubr.bf16.gmra.mrb[44].mxu1 %v6877_v54  ;;  %v1425_v54 = vrot.slane %v6689_v32, 1  ;;  %v6914_v59 = vsel %vm447_vm0, %v662_v14, %v666_v5 }
  0xd3   : > { %5299 = vmatmul.mubr.bf16.gmra.mrb[12].mxu0 %v6881_v56  ;;  %4934 = vmatprep.mubr.bf16.mxu1 %v6884_v61  ;;  %v6907_v61 = vsel %vm447_vm0, %v654_v31, %v658_v3  ;;  %7904 = vst [vmem:[#allocation30_spill] sm:$0xff] %v6914_v59  ;;  %v674_v3 = vrot.slane %v672_v25, 1  ;;  %v6924_v31 = vld [vmem:[%s6597_s3 + $0xf0] sm:$0xff]  }
  0xd4   : > { %5302 = vmatprep.mubr.bf16.mxu0 %v6889_v42  ;;  %5363 = vmatpush3.bf16.msra.mxu0 %v6225_v33  ;;  %7903 = vst [vmem:[#allocation29_spill] sm:$0xff] %v6907_v61  ;;  %v676_v33 = vshrl.u32 %v6893_v39, 16  ;;  %v6919_v52 = vsel %vm1399_vm1, %v1423_v43, %v1425_v54  ;;  %v682_v43 = vrot.slane %v680_v8, 1  ;;  %v688_v25 = vshll.u32 %v6924_v31, 16  ;;  %v6948_v8 = vld [vmem:[%s6597_s3 + $0x100] sm:$0xf] }
  0xd5   : > { %5364 = vmatprep.subr.bf16.mxu0 %v6227_v47  ;;  %v692_v48 = vshrl.u32 %v6924_v31, 16 }
  0xd6   : > { %v678_v14 = vor.u32 %v676_v33, %v674_v3  ;;  %v696_v33 = vshll.u32 %v6931_v49, 16 }
  0xd8   : > { %5365 = vmatpush3.bf16.msra.mxu0 %v6227_v47  ;;  %v1427_v47 = vrot.slane %v6703_v45, 1  ;;  %v6943_v5 = vsel %vm447_vm0, %v678_v14, %v682_v43  ;;  %v1431_v14 = vrot.slane %v6728_v0, 1  ;;  %v698_v12 = vrot.slane %v696_v33, 1 }
  0xd9   : > { %5430 = vmatprep.subr.bf16.mxu0 %v6903_v1  ;;  %7906 = vst [vmem:[#allocation32_spill] sm:$0xff] %v6943_v5 }
  0xda   : > { %4935 = vmatmul.mubr.bf16.gmra.mrb[48].mxu1 %v6907_v61  ;;  %v6936_v61 = vsel %vm447_vm0, %v670_v44, %v674_v3  ;;  %v6951_v34 = vsel %vm1399_vm1, %v1427_v47, %v1429_v60  ;;  %v690_v3 = vrot.slane %v688_v25, 1  ;;  %v6958_v44 = vcombine.low %v6948_v8, %v6948_v8 }
  0xdb   : > { %5303 = vmatmul.mubr.bf16.gmra.mrb[16].mxu0 %v6911_v41  ;;  %4938 = vmatprep.mubr.bf16.mxu1 %v6914_v59  ;;  %7905 = vst [vmem:[#allocation31_spill] sm:$0xff] %v6936_v61  ;;  %v6940_v59 = vsel %vm1399_vm1, %v1425_v54, %v1427_v47  ;;  %v686_v54 = vor.u32 %v684_v63, %v682_v43  ;;  %v1433_v47 = vrot.slane %v6732_v6, 1  ;;  %v700_v25 = vshrl.u32 %v6931_v49, 16 }
  0xdc   : > { %5306 = vmatprep.mubr.bf16.mxu0 %v6919_v52  ;;  %7907 = vst [vmem:[#allocation33_spill] sm:$0xff] %v6958_v44  ;;  %v694_v30 = vor.u32 %v692_v48, %v690_v3  ;;  %v6969_v63 = vsel %vm1399_vm1, %v1429_v60, %v1431_v14  ;;  %v1435_v60 = vrot.slane %v6749_v22, 1 }
  0xdd   : > { %v6975_v9 = vsel %vm1399_vm1, %v1431_v14, %v1433_v47  ;;  %v6980_v48 = vor.u32 %v700_v25, %v698_v12  ;;  %v1441_v25 = vrot.slane %v6769_v36, 1 }
  0xde   : > { %v6972_v43 = vsel %vm447_vm0, %v694_v30, %v698_v12  ;;  %v1437_v30 = vrot.slane %v6754_v28, 1  ;;  %v6995_v12 = vld [vmem:[%s6597_s3] sm:$0xff]  }
  0xdf   : > { %7909 = vst [vmem:[#allocation35_spill] sm:$0xff] %v6972_v43  ;;  %7910 = vst [vmem:[#allocation36_spill] sm:$0xff] %v6980_v48 }
  0xe0   : > { %v6991_v14 = vsel %vm1399_vm1, %v1435_v60, %v1437_v30 }
  0xe2   : > { %4939 = vmatmul.mubr.bf16.gmra.mrb[52].mxu1 %v6936_v61  ;;  %v6964_v61 = vsel %vm447_vm0, %v686_v54, %v690_v3  ;;  %v6988_v54 = vsel %vm1399_vm1, %v1433_v47, %v1435_v60  ;;  %v6222_v60 = vld [vmem:[#allocation5 + $0x88] sm:$0xff]  }
  0xe3   : > { %5307 = vmatmul.mubr.bf16.gmra.mrb[20].mxu0 %v6940_v59  ;;  %4942 = vmatprep.mubr.bf16.mxu1 %v6943_v5  ;;  %7908 = vst [vmem:[#allocation34_spill] sm:$0xff] %v6964_v61  ;;  %v704_v5 = vshll.u32 %v6958_v44, 16  ;;  %v6226_v44 = vld [vmem:[#allocation5 + $0x98] sm:$0xff]  }
  0xe4   : > { %5310 = vmatprep.mubr.bf16.mxu0 %v6951_v34 }
  0xe5   : > { %v706_v33 = vrot.slane %v704_v5, 1  ;;  %v1439_v5 = vrot.slane %v6766_v35, 1 }
  0xe7   : > { %v707_v3 = vsel %vm447_vm0, %v6980_v48, %v706_v33  ;;  %v7002_v47 = vsel %vm1399_vm1, %v1437_v30, %v1439_v5  ;;  %v7005_v33 = vsel %vm1399_vm1, %v1439_v5, %v1441_v25  ;;  %v7014_v48 = vld [vmem:[%s6597_s3 + $0x10] sm:$0xff]   ;;  %v1443_v30 = vrot.slane %v6779_v46, 1 }
  0xe8   : > { %7911 = vst [vmem:[#allocation37_spill] sm:$0xff] %v7005_v33  ;;  %7912 = vst [vmem:[#allocation38_spill] sm:$0xff] %v7014_v48  ;;  %v6224_v5 = vld [vmem:[#allocation5 + $0x90] sm:$0xff]  }
  0xea   : > { %4943 = vmatmul.mubr.bf16.gmra.mrb[56].mxu1 %v6964_v61  ;;  %v7021_v61 = vsel %vm1399_vm1, %v1441_v25, %v1443_v30  ;;  %v1447_v25 = vrot.slane %v6811_v17, 1 }
  0xeb   : > { %5311 = vmatmul.mubr.bf16.gmra.mrb[24].mxu0 %v6969_v63  ;;  %4946 = vmatprep.mubr.bf16.mxu1 %v6972_v43  ;;  %v1445_v43 = vrot.slane %v6800_v37, 1  ;;  %7913 = vst [vmem:[#allocation39_spill] sm:$0xff] %v7021_v61 }
  0xec   : > { %5314 = vmatprep.mubr.bf16.mxu0 %v6975_v9 }
  0xed   : > { %v7039_v55 = vsel %vm1399_vm1, %v1445_v43, %v1447_v25 }
  0xee   : > { %7916 = vst [vmem:[#allocation42_spill] sm:$0xff] %v7039_v55 }
  0xf2   : > { %4947 = vmatmul.mubr.bf16.gmra.mrb[60].mxu1 %v707_v3  ;;  %v7008_v3 = vld [vmem:[%s6597_s3 + $0x8] sm:$0xff]  }
  0xf3   : > { %5315 = vmatmul.mubr.bf16.gmra.mrb[28].mxu0 %v6988_v54  ;;  %4966 = vmatprep.mubr.bf16.mxu1 %v6995_v12 }
  0xf4   : > { %5318 = vmatprep.mubr.bf16.mxu0 %v6991_v14 }
  0xfa   : > { %4967 = vmatmul.mubr.bf16.vlgmr.msra.gmra.mrb[0].mxu1 %v7008_v3 }
  0xfb   : > { %5319 = vmatmul.mubr.bf16.gmra.mrb[32].mxu0 %v7002_v47  ;;  %5031 = vmatpush3.bf16.msra.mxu1 %v6751_v27  ;;  %v7024_v27 = vsel %vm1399_vm1, %v1443_v30, %v1445_v43  ;;  %v6230_v30 = vld [vmem:[#allocation5 + $0xa0] sm:$0xff]   ;;  %v1453_v43 = vrot.slane %v6872_v10, 1 }
  0xfc   : > { %4970 = vmatprep.mubr.bf16.mxu1 %v7014_v48  ;;  %5322 = vmatprep.mubr.bf16.mxu0 %v7005_v33  ;;  %7914 = vst [vmem:[#allocation40_spill] sm:$0xff] %v7024_v27  ;;  %v7032_v48 = vld [vmem:[%s6597_s3 + $0x20] sm:$0xff]  }
  0xfd   : > { %5032 = vmatprep.subr.bf16.mxu1 %v6222_v60 }
  0xff   : > { %5033 = vmatpush3.bf16.msra.mxu1 %v6222_v60  ;;  %v1449_v60 = vrot.slane %v6843_v53, 1 }
 0x100   : > { %5034 = vmatprep.subr.bf16.mxu1 %v6224_v5 }
 0x102   : > { %4971 = vmatmul.mubr.bf16.gmra.mrb[4].mxu1 %v7027_v58  ;;  %v7042_v58 = vsel %vm1399_vm1, %v1447_v25, %v1449_v60  ;;  %v6234_v25 = vld [vmem:[#allocation5 + $0xb0] sm:$0xff]  }
 0x103   : > { %5323 = vmatmul.mubr.bf16.gmra.mrb[36].mxu0 %v7021_v61  ;;  %4974 = vmatprep.mubr.bf16.mxu1 %v7032_v48  ;;  %7917 = vst [vmem:[#allocation43_spill] sm:$0xff] %v7042_v58  ;;  %v6236_v61 = vld [vmem:[#allocation5 + $0xb8] sm:$0xff]  }
 0x104   : > { %5326 = vmatprep.mubr.bf16.mxu0 %v7024_v27  ;;  %5035 = vmatpush3.bf16.msra.mxu1 %v6224_v5  ;;  %v7050_v5 = vld [vmem:[%s6597_s3 + $0x30] sm:$0xff]  }
 0x105   : > { %5036 = vmatprep.subr.bf16.mxu1 %v6226_v44 }
 0x108   : > { %5037 = vmatpush3.bf16.msra.mxu1 %v6226_v44  ;;  %v1451_v44 = vrot.slane %v6865_v16, 1 }
 0x109   : > { %5038 = vmatprep.subr.bf16.mxu1 %v6230_v30 }
 0x10a   : > { %4975 = vmatmul.mubr.bf16.gmra.mrb[8].mxu1 %v7045_v38  ;;  %v7057_v27 = vsel %vm1399_vm1, %v1449_v60, %v1451_v44  ;;  %v1457_v60 = vrot.slane %v6900_v20, 1 }
 0x10b   : > { %5327 = vmatmul.mubr.bf16.gmra.mrb[40].mxu0 %v7039_v55  ;;  %4978 = vmatprep.mubr.bf16.mxu1 %v7050_v5  ;;  %7918 = vst [vmem:[#allocation44_spill] sm:$0xff] %v7057_v27  ;;  %v7060_v55 = vsel %vm1399_vm1, %v1451_v44, %v1453_v43  ;;  %v7074_v44 = vld [vmem:[#allocation5 + $0xc0] sm:$0xff]  }
 0x10c   : > { %5330 = vmatprep.mubr.bf16.mxu0 %v7042_v58  ;;  %5039 = vmatpush3.bf16.msra.mxu1 %v6230_v30  ;;  %7919 = vst [vmem:[#allocation45_spill] sm:$0xff] %v7060_v55  ;;  %v7068_v30 = vld [vmem:[%s6597_s3 + $0x40] sm:$0xff]  }
 0x10d   : > { %5040 = vmatprep.subr.bf16.mxu1 %v6232_v40 }
 0x110   : > { %5041 = vmatpush3.bf16.msra.mxu1 %v6232_v40  ;;  %v1455_v40 = vrot.slane %v6893_v39, 1 }
 0x111   : > { %5042 = vmatprep.subr.bf16.mxu1 %v6234_v25 }
 0x112   : > { %4979 = vmatmul.mubr.bf16.gmra.mrb[12].mxu1 %v7063_v24  ;;  %v7077_v58 = vsel %vm1399_vm1, %v1453_v43, %v1455_v40  ;;  %v1459_v43 = vrot.slane %v6924_v31, 1 }
 0x113   : > { %5331 = vmatmul.mubr.bf16.gmra.mrb[44].mxu0 %v7057_v27  ;;  %4982 = vmatprep.mubr.bf16.mxu1 %v7068_v30  ;;  %7920 = vst [vmem:[#allocation46_spill] sm:$0xff] %v7077_v58  ;;  %v7080_v27 = vsel %vm1399_vm1, %v1455_v40, %v1457_v60 }
 0x114   : > { %5334 = vmatprep.mubr.bf16.mxu0 %v7060_v55  ;;  %5043 = vmatpush3.bf16.msra.mxu1 %v6234_v25  ;;  %v7084_v55 = vld [vmem:[%s6597_s3 + $0x48] sm:$0xff]   ;;  %v243_v25 = vld [vmem:[%s6597_s3 + $0x104] sm:$0xf]  ;;  %v7099_v33 = vsel %vm1399_vm1, %v1457_v60, %v1459_v43  ;;  %v7117_v60 = vld [vmem:[%s6597_s3 + $0x110] sm:$0xf] }
 0x115   : > { %5044 = vmatprep.subr.bf16.mxu1 %v6236_v61  ;;  %v7096_v40 = vcombine.low %v6948_v8, %v243_v25  ;;  %v7114_v8 = vrot.slane %v7106_v21, 1 }
 0x117   : > { %7922 = vst [vmem:[#allocation48_spill] sm:$0xff] %v7114_v8 }
 0x118   : > { %5045 = vmatpush3.bf16.msra.mxu1 %v6236_v61  ;;  %v7093_v61 = vrot.slane %v6931_v49, 1 }
 0x119   : > { %5110 = vmatprep.subr.bf16.mxu1 %v7074_v44 }
 0x11a   : > { %4983 = vmatmul.mubr.bf16.gmra.mrb[16].mxu1 %v7084_v55  ;;  %7921 = vst [vmem:[#allocation47_spill] sm:$0xff] %v7093_v61 }
 0x11b   : > { %5335 = vmatmul.mubr.bf16.gmra.mrb[48].mxu0 %v7077_v58  ;;  %4986 = vmatprep.mubr.bf16.mxu1 %v6665_v11  ;;  %v7103_v58 = vsel %vm1399_vm1, %v1459_v43, %v7093_v61  ;;  %v2596_v11 = vrot.slane %v7096_v40, 1 }
 0x11c   : > { %5338 = vmatprep.mubr.bf16.mxu0 %v7080_v27 }
 0x11d   : > { %v7121_v43 = vsel %vm1399_vm1, %v7093_v61, %v2596_v11 }
 0x11e   : > { %7923 = vst [vmem:[#allocation49_spill] sm:$0xff] %v7121_v43 }
 0x122   : > { %4987 = vmatmul.mubr.bf16.gmra.mrb[20].mxu1 %v6669_v13  ;;  %v7125_v13 = vcombine.low %v7117_v60, %v7117_v60 }
 0x123   : > { %5339 = vmatmul.mubr.bf16.gmra.mrb[52].mxu0 %v7099_v33  ;;  %4990 = vmatprep.mubr.bf16.mxu1 %v6685_v29  ;;  %v7129_v29 = vsel %vm1399_vm1, %v2596_v11, %v7114_v8  ;;  %v6233_v11 = vld [vmem:[#allocation5 + $0x1c8] sm:$0xff]  }
 0x124   : > { %5342 = vmatprep.mubr.bf16.mxu0 %v7103_v58  ;;  %7924 = vst [vmem:[#allocation50_spill] sm:$0xff] %v7125_v13  ;;  %7925 = vst [vmem:[#allocation51_spill] sm:$0xff] %v7129_v29  ;;  %v2600_v25 = vrot.slane %v7125_v13, 1  ;;  %v7164_v13 = vld [vmem:[%s6597_s3 + $0x60] sm:$0xff]  }
 0x126   : > { %v2601_v61 = vsel %vm1399_vm1, %v7114_v8, %v2600_v25  ;;  %v6239_v25 = vld [vmem:[#allocation5 + $0x1e0] sm:$0xff]   ;;  %v7159_v8 = vld [vmem:[%s6597_s3 + $0x58] sm:$0xff]  }
 0x12a   : > { %4991 = vmatmul.mubr.bf16.gmra.mrb[24].mxu1 %v6689_v32  ;;  %v6235_v32 = vld [vmem:[#allocation5 + $0x1d0] sm:$0xff]  }
 0x12b   : > { %5343 = vmatmul.mubr.bf16.gmra.mrb[56].mxu0 %v7121_v43  ;;  %4994 = vmatprep.mubr.bf16.mxu1 %v6703_v45  ;;  %v2231_v43 = vshrl.u32 %v7106_v21, 16 }
 0x12c   : > { %5346 = vmatprep.mubr.bf16.mxu0 %v7129_v29 }
 0x132   : > { %4995 = vmatmul.mubr.bf16.gmra.mrb[28].mxu1 %v6709_v50 }
 0x133   : > { %5347 = vmatmul.mubr.bf16.gmra.mrb[60].mxu0 %v2601_v61  ;;  %4998 = vmatprep.mubr.bf16.mxu1 %v6728_v0  ;;  %v6237_v61 = vld [vmem:[#allocation5 + $0x1d8] sm:$0xff]  }
 0x134   : > { %5366 = vmatprep.mubr.bf16.mxu0 %v7032_v48 }
 0x13a   : > { %4999 = vmatmul.mubr.bf16.gmra.mrb[32].mxu1 %v6732_v6 }
 0x13b   : > { %5367 = vmatmul.mubr.bf16.vlgmr.msra.gmra.mrb[0].mxu0 %v7045_v38  ;;  %5002 = vmatprep.mubr.bf16.mxu1 %v6749_v22 }
 0x13c   : > { %5431 = vmatpush3.bf16.msra.mxu0 %v6903_v1  ;;  %5370 = vmatprep.mubr.bf16.mxu0 %v7050_v5  ;;  %v6241_v1 = vld [vmem:[#allocation5 + $0x1e8] sm:$0xff]  }
 0x13d   : > { %5432 = vmatprep.subr.bf16.mxu0 %v6233_v11 }
 0x140   : > { %5433 = vmatpush3.bf16.msra.mxu0 %v6233_v11  ;;  %v7154_v11 = vld [vmem:[%s6597_s3 + $0x50] sm:$0xff]  }
 0x141   : > { %5434 = vmatprep.subr.bf16.mxu0 %v6235_v32 }
 0x142   : > { %5003 = vmatmul.mubr.bf16.gmra.mrb[36].mxu1 %v6754_v28 }
 0x143   : > { %5371 = vmatmul.mubr.bf16.gmra.mrb[4].mxu0 %v7063_v24  ;;  %5006 = vmatprep.mubr.bf16.mxu1 %v6766_v35 }
 0x144   : > { %5374 = vmatprep.mubr.bf16.mxu0 %v7068_v30  ;;  %5435 = vmatpush3.bf16.msra.mxu0 %v6235_v32  ;;  %v6243_v32 = vld [vmem:[#allocation5 + $0x1f0] sm:$0xff]  }
 0x145   : > { %5436 = vmatprep.subr.bf16.mxu0 %v6237_v61 }
 0x148   : > { %5437 = vmatpush3.bf16.msra.mxu0 %v6237_v61  ;;  %v6245_v61 = vld [vmem:[#allocation5 + $0x1f8] sm:$0xff]  }
 0x149   : > { %5438 = vmatprep.subr.bf16.mxu0 %v6239_v25 }
 0x14a   : > { %5007 = vmatmul.mubr.bf16.gmra.mrb[40].mxu1 %v6769_v36 }
 0x14b   : > { %5375 = vmatmul.mubr.bf16.gmra.mrb[8].mxu0 %v7084_v55  ;;  %5010 = vmatprep.mubr.bf16.mxu1 %v6779_v46 }
 0x14c   : > { %5378 = vmatprep.mubr.bf16.mxu0 %v7154_v11  ;;  %5439 = vmatpush3.bf16.msra.mxu0 %v6239_v25  ;;  %v7167_v25 = vld [vmem:[#allocation5 + $0x200] sm:$0xff]  }
 0x14d   : > { %5440 = vmatprep.subr.bf16.mxu0 %v6241_v1 }
 0x150   : > { %5441 = vmatpush3.bf16.msra.mxu0 %v6241_v1  ;;  %v7172_v1 = vld [vmem:[%s6597_s3 + $0x68] sm:$0xff]  }
 0x151   : > { %5442 = vmatprep.subr.bf16.mxu0 %v6243_v32 }
 0x152   : > { %5011 = vmatmul.mubr.bf16.gmra.mrb[44].mxu1 %v6800_v37 }
 0x153   : > { %5379 = vmatmul.mubr.bf16.gmra.mrb[12].mxu0 %v7159_v8  ;;  %5014 = vmatprep.mubr.bf16.mxu1 %v6811_v17 }
 0x154   : > { %5382 = vmatprep.mubr.bf16.mxu0 %v7164_v13  ;;  %5443 = vmatpush3.bf16.msra.mxu0 %v6243_v32  ;;  %v1400_v32 = vrot.slane %v6995_v12, 1  ;;  %v6251_v12 = vld [vmem:[#allocation5 + $0x208] sm:$0xff]  }
 0x155   : > { %5444 = vmatprep.subr.bf16.mxu0 %v6245_v61 }
 0x158   : > { %5445 = vmatpush3.bf16.msra.mxu0 %v6245_v61 }
 0x159   : > { %5510 = vmatprep.subr.bf16.mxu0 %v7167_v25 }
 0x15a   : > { %5015 = vmatmul.mubr.bf16.gmra.mrb[48].mxu1 %v6843_v53 }
 0x15b   : > { %5383 = vmatmul.mubr.bf16.gmra.mrb[16].mxu0 %v7172_v1  ;;  %5018 = vmatprep.mubr.bf16.mxu1 %v6865_v16 }
 0x15c   : > { %5386 = vmatprep.mubr.bf16.mxu0 %v6703_v45  ;;  %v1401_v45 = vrot.slane %v7008_v3, 1  ;;  %v6253_v3 = vld [vmem:[#allocation5 + $0x210] sm:$0xff]  }
 0x15e   : > { %v1402_v61 = vsel %vm1399_vm1, %v1400_v32, %v1401_v45  ;;  %v7930_v32 = vld [vmem:[#allocation12_spill] sm:$0xff] }
 0x162   : > { %5019 = vmatmul.mubr.bf16.gmra.mrb[52].mxu1 %v6872_v10 }
 0x163   : > { %5387 = vmatmul.mubr.bf16.gmra.mrb[20].mxu0 %v6709_v50  ;;  %5022 = vmatprep.mubr.bf16.mxu1 %v6893_v39  ;;  %v7926_v50 = vrot.slane %v6610_v18, 1  ;;  %v6248_v18 = vld [vmem:[#allocation5 + $0xe0] sm:$0xff]  }
 0x164   : > { %5390 = vmatprep.mubr.bf16.mxu0 %v6728_v0 }
 0x165   : > { %v1404_v0 = vsel %vm1399_vm1, %v1401_v45, %v7926_v50  ;;  %v7932_v45 = vld [vmem:[#allocation13_spill] sm:$0xff]  ;;  %v7934_v50 = vld [vmem:[#allocation14_spill] sm:$0xff] }
 0x16a   : > { %5023 = vmatmul.mubr.bf16.gmra.mrb[56].mxu1 %v6900_v20 }
 0x16b   : > { %5391 = vmatmul.mubr.bf16.gmra.mrb[24].mxu0 %v6732_v6  ;;  %5026 = vmatprep.mubr.bf16.mxu1 %v6924_v31  ;;  %v6240_v6 = vld [vmem:[#allocation5 + $0xc8] sm:$0xff]  }
 0x16c   : > { %5394 = vmatprep.mubr.bf16.mxu0 %v6749_v22  ;;  %v6242_v22 = vld [vmem:[#allocation5 + $0xd0] sm:$0xff]  }
 0x172   : > { %5027 = vmatmul.mubr.bf16.gmra.mrb[60].mxu1 %v6931_v49 }
 0x173   : > { %5395 = vmatmul.mubr.bf16.gmra.mrb[28].mxu0 %v6754_v28  ;;  %5046 = vmatprep.mubr.bf16.mxu1 %v1402_v61  ;;  %v6244_v28 = vld [vmem:[#allocation5 + $0xd8] sm:$0xff]   ;;  %v7933_v61 = vld [vmem:[#allocation40_spill] sm:$0xff] }
 0x174   : > { %5398 = vmatprep.mubr.bf16.mxu0 %v6766_v35  ;;  %v6250_v35 = vld [vmem:[#allocation5 + $0xe8] sm:$0xff]  }
 0x17a   : > { %5047 = vmatmul.mubr.bf16.vlgmr.msra.gmra.mrb[0].mxu1 %v1404_v0  ;;  %v6258_v0 = vld [vmem:[#allocation5 + $0x230] sm:$0xff]  }
 0x17b   : > { %5399 = vmatmul.mubr.bf16.gmra.mrb[32].mxu0 %v6769_v36  ;;  %5111 = vmatpush3.bf16.msra.mxu1 %v7074_v44  ;;  %v6252_v36 = vld [vmem:[#allocation5 + $0xf0] sm:$0xff]   ;;  %v6255_v44 = vld [vmem:[#allocation5 + $0x218] sm:$0xff]  }
 0x17c   : > { %5050 = vmatprep.mubr.bf16.mxu1 %v6796_v2  ;;  %5402 = vmatprep.mubr.bf16.mxu0 %v6779_v46  ;;  %v6254_v46 = vld [vmem:[#allocation5 + $0xf8] sm:$0xff]   ;;  %v7210_v2 = vld [vmem:[#allocation5 + $0x100] sm:$0xff]  }
 0x17d   : > { %5112 = vmatprep.subr.bf16.mxu1 %v6240_v6 }
 0x17f   : > { %5113 = vmatpush3.bf16.msra.mxu1 %v6240_v6  ;;  %v6259_v6 = vld [vmem:[#allocation5 + $0x238] sm:$0xff]  }
 0x180   : > { %5114 = vmatprep.subr.bf16.mxu1 %v6242_v22 }
 0x182   : > { %5051 = vmatmul.mubr.bf16.gmra.mrb[4].mxu1 %v6814_v23  ;;  %v7230_v23 = vld [vmem:[%s6597_s3 + $0x118] sm:$0xff]  }
 0x183   : > { %5403 = vmatmul.mubr.bf16.gmra.mrb[36].mxu0 %v6800_v37  ;;  %5054 = vmatprep.mubr.bf16.mxu1 %v6820_v26  ;;  %v247_v37 = vld [vmem:[%s6597_s3 + $0x114] sm:$0xf] }
 0x184   : > { %5406 = vmatprep.mubr.bf16.mxu0 %v6811_v17  ;;  %5115 = vmatpush3.bf16.msra.mxu1 %v6242_v22  ;;  %v7223_v17 = vcombine.low %v7117_v60, %v247_v37  ;;  %v7928_v60 = vld [vmem:[#allocation11_spill] sm:$0xff]  ;;  %v7935_v22 = vld [vmem:[#allocation42_spill] sm:$0xff]  ;;  %v7941_v37 = vld [vmem:[#allocation45_spill] sm:$0xff] }
 0x185   : > { %5116 = vmatprep.subr.bf16.mxu1 %v6244_v28 }
 0x186   : > { %7927 = vst [vmem:[#allocation52_spill] sm:$0xff] %v7223_v17 }
 0x188   : > { %5117 = vmatpush3.bf16.msra.mxu1 %v6244_v28  ;;  %v7936_v28 = vld [vmem:[#allocation15_spill] sm:$0xff] }
 0x189   : > { %5118 = vmatprep.subr.bf16.mxu1 %v6248_v18 }
 0x18a   : > { %5055 = vmatmul.mubr.bf16.gmra.mrb[8].mxu1 %v6833_v51 }
 0x18b   : > { %5407 = vmatmul.mubr.bf16.gmra.mrb[40].mxu0 %v6843_v53  ;;  %5058 = vmatprep.mubr.bf16.mxu1 %v6839_v19 }
 0x18c   : > { %5410 = vmatprep.mubr.bf16.mxu0 %v6865_v16  ;;  %5119 = vmatpush3.bf16.msra.mxu1 %v6248_v18  ;;  %v7937_v18 = vld [vmem:[#allocation43_spill] sm:$0xff] }
 0x18d   : > { %5120 = vmatprep.subr.bf16.mxu1 %v6250_v35 }
 0x190   : > { %5121 = vmatpush3.bf16.msra.mxu1 %v6250_v35  ;;  %v7938_v35 = vld [vmem:[#allocation16_spill] sm:$0xff] }
 0x191   : > { %5122 = vmatprep.subr.bf16.mxu1 %v6252_v36 }
 0x192   : > { %5059 = vmatmul.mubr.bf16.gmra.mrb[12].mxu1 %v6853_v62 }
 0x193   : > { %5411 = vmatmul.mubr.bf16.gmra.mrb[44].mxu0 %v6872_v10  ;;  %5062 = vmatprep.mubr.bf16.mxu1 %v6861_v15 }
 0x194   : > { %5414 = vmatprep.mubr.bf16.mxu0 %v6893_v39  ;;  %5123 = vmatpush3.bf16.msra.mxu1 %v6252_v36  ;;  %v7939_v36 = vld [vmem:[#allocation44_spill] sm:$0xff] }
 0x195   : > { %5124 = vmatprep.subr.bf16.mxu1 %v6254_v46 }
 0x198   : > { %5125 = vmatpush3.bf16.msra.mxu1 %v6254_v46  ;;  %v7940_v46 = vld [vmem:[#allocation17_spill] sm:$0xff] }
 0x199   : > { %5590 = vmatprep.subr.bf16.mxu1 %v7210_v2 }
 0x19a   : > { %5063 = vmatmul.mubr.bf16.gmra.mrb[16].mxu1 %v6881_v56 }
 0x19b   : > { %5415 = vmatmul.mubr.bf16.gmra.mrb[48].mxu0 %v6900_v20  ;;  %5066 = vmatprep.mubr.bf16.mxu1 %v6889_v42 }
 0x19c   : > { %5418 = vmatprep.mubr.bf16.mxu0 %v6924_v31 }
 0x1a2   : > { %5067 = vmatmul.mubr.bf16.gmra.mrb[20].mxu1 %v6911_v41 }
 0x1a3   : > { %5419 = vmatmul.mubr.bf16.gmra.mrb[52].mxu0 %v6931_v49  ;;  %5070 = vmatprep.mubr.bf16.mxu1 %v6919_v52 }
 0x1a4   : > { %5422 = vmatprep.mubr.bf16.mxu0 %v7096_v40 }
 0x1aa   : > { %5071 = vmatmul.mubr.bf16.gmra.mrb[24].mxu1 %v6940_v59 }
 0x1ab   : > { %5423 = vmatmul.mubr.bf16.gmra.mrb[56].mxu0 %v7106_v21  ;;  %5074 = vmatprep.mubr.bf16.mxu1 %v6951_v34 }
 0x1ac   : > { %5426 = vmatprep.mubr.bf16.mxu0 %v7223_v17 }
 0x1b2   : > { %5075 = vmatmul.mubr.bf16.gmra.mrb[28].mxu1 %v6969_v63 }
 0x1b3   : > { %5427 = vmatmul.mubr.bf16.gmra.mrb[60].mxu0 %v7230_v23  ;;  %5078 = vmatprep.mubr.bf16.mxu1 %v6975_v9 }
 0x1b4   : > { %5446 = vmatprep.mubr.bf16.mxu0 %v6643_v57  ;;  %v7929_v57 = vld [vmem:[#allocation37_spill] sm:$0xff] }
 0x1ba   : > { %5079 = vmatmul.mubr.bf16.gmra.mrb[32].mxu1 %v6988_v54 }
 0x1bb   : > { %5447 = vmatmul.mubr.bf16.vlgmr.msra.gmra.mrb[0].mxu0 %v6654_v4  ;;  %5082 = vmatprep.mubr.bf16.mxu1 %v6991_v14  ;;  %v6256_v4 = vld [vmem:[#allocation5 + $0x220] sm:$0xff]  }
 0x1bc   : > { %5511 = vmatpush3.bf16.msra.mxu0 %v7167_v25  ;;  %5450 = vmatprep.mubr.bf16.mxu0 %v6659_v7  ;;  %v6257_v25 = vld [vmem:[#allocation5 + $0x228] sm:$0xff]   ;;  %v7931_v7 = vld [vmem:[#allocation39_spill] sm:$0xff] }
 0x1bd   : > { %5512 = vmatprep.subr.bf16.mxu0 %v6251_v12 }
 0x1c0   : > { %5513 = vmatpush3.bf16.msra.mxu0 %v6251_v12  ;;  %v7942_v12 = vld [vmem:[#allocation18_spill] sm:$0xff] }
 0x1c1   : > { %5514 = vmatprep.subr.bf16.mxu0 %v6253_v3 }
 0x1c2   : > { %5083 = vmatmul.mubr.bf16.gmra.mrb[36].mxu1 %v7002_v47 }
 0x1c3   : > { %5451 = vmatmul.mubr.bf16.gmra.mrb[4].mxu0 %v7928_v60  ;;  %5086 = vmatprep.mubr.bf16.mxu1 %v7929_v57  ;;  %v7945_v60 = vld [vmem:[#allocation20_spill] sm:$0xff] }
 0x1c4   : > { %5454 = vmatprep.mubr.bf16.mxu0 %v7930_v32  ;;  %5515 = vmatpush3.bf16.msra.mxu0 %v6253_v3  ;;  %v7943_v3 = vld [vmem:[#allocation46_spill] sm:$0xff]  ;;  %v7946_v32 = vld [vmem:[#allocation21_spill] sm:$0xff] }
 0x1c5   : > { %5516 = vmatprep.subr.bf16.mxu0 %v6255_v44 }
 0x1c8   : > { %5517 = vmatpush3.bf16.msra.mxu0 %v6255_v44  ;;  %v7944_v44 = vld [vmem:[#allocation19_spill] sm:$0xff] }
 0x1c9   : > { %5518 = vmatprep.subr.bf16.mxu0 %v6256_v4 }
 0x1ca   : > { %5087 = vmatmul.mubr.bf16.gmra.mrb[40].mxu1 %v7931_v7 }
 0x1cb   : > { %5455 = vmatmul.mubr.bf16.gmra.mrb[8].mxu0 %v7932_v45  ;;  %5090 = vmatprep.mubr.bf16.mxu1 %v7933_v61  ;;  %v7948_v45 = vld [vmem:[#allocation22_spill] sm:$0xff] }
 0x1cc   : > { %5458 = vmatprep.mubr.bf16.mxu0 %v7934_v50  ;;  %5519 = vmatpush3.bf16.msra.mxu0 %v6256_v4  ;;  %v7947_v4 = vld [vmem:[#allocation33_spill] sm:$0xff]  ;;  %v7949_v50 = vld [vmem:[#allocation47_spill] sm:$0xff] }
 0x1cd   : > { %5520 = vmatprep.subr.bf16.mxu0 %v6257_v25 }
 0x1d0   : > { %5521 = vmatpush3.bf16.msra.mxu0 %v6257_v25  ;;  %v1463_v25 = vrot.slane %v7947_v4, 1  ;;  %v7956_v4 = vld [vmem:[#allocation27_spill] sm:$0xff] }
 0x1d1   : > { %5522 = vmatprep.subr.bf16.mxu0 %v6258_v0 }
 0x1d2   : > { %5091 = vmatmul.mubr.bf16.gmra.mrb[44].mxu1 %v7935_v22 }
 0x1d3   : > { %5459 = vmatmul.mubr.bf16.gmra.mrb[12].mxu0 %v7936_v28  ;;  %5094 = vmatprep.mubr.bf16.mxu1 %v7937_v18  ;;  %v7951_v28 = vld [vmem:[#allocation38_spill] sm:$0xff] }
 0x1d4   : > { %5462 = vmatprep.mubr.bf16.mxu0 %v7938_v35  ;;  %5523 = vmatpush3.bf16.msra.mxu0 %v6258_v0  ;;  %v1464_v0 = vsel %vm1399_vm1, %v7949_v50, %v1463_v25  ;;  %v7952_v35 = vld [vmem:[#allocation24_spill] sm:$0xff]  ;;  %v6280_v50 = vld [vmem:[#allocation5 + $0x118] sm:$0xff]  }
 0x1d5   : > { %5524 = vmatprep.subr.bf16.mxu0 %v6259_v6  ;;  %v7957_v25 = vld [vmem:[#allocation28_spill] sm:$0xff] }
 0x1d8   : > { %5525 = vmatpush3.bf16.msra.mxu0 %v6259_v6  ;;  %v7950_v6 = vld [vmem:[#allocation23_spill] sm:$0xff] }
 0x1da   : > { %5095 = vmatmul.mubr.bf16.gmra.mrb[48].mxu1 %v7939_v36 }
 0x1db   : > { %5463 = vmatmul.mubr.bf16.gmra.mrb[16].mxu0 %v7940_v46  ;;  %5098 = vmatprep.mubr.bf16.mxu1 %v7941_v37  ;;  %v7953_v46 = vld [vmem:[#allocation41_spill] sm:$0xff] }
 0x1dc   : > { %5466 = vmatprep.mubr.bf16.mxu0 %v7942_v12  ;;  %v7954_v12 = vld [vmem:[#allocation25_spill] sm:$0xff] }
 0x1e2   : > { %5099 = vmatmul.mubr.bf16.gmra.mrb[52].mxu1 %v7943_v3 }
 0x1e3   : > { %5467 = vmatmul.mubr.bf16.gmra.mrb[20].mxu0 %v7944_v44  ;;  %5102 = vmatprep.mubr.bf16.mxu1 %v7080_v27  ;;  %v7955_v44 = vld [vmem:[#allocation26_spill] sm:$0xff] }
 0x1e4   : > { %5470 = vmatprep.mubr.bf16.mxu0 %v7945_v60  ;;  %v6278_v60 = vld [vmem:[#allocation5 + $0x108] sm:$0xff]  }
 0x1ea   : > { %5103 = vmatmul.mubr.bf16.gmra.mrb[56].mxu1 %v7099_v33 }
 0x1eb   : > { %5471 = vmatmul.mubr.bf16.gmra.mrb[24].mxu0 %v7946_v32  ;;  %5106 = vmatprep.mubr.bf16.mxu1 %v7103_v58  ;;  %v6279_v32 = vld [vmem:[#allocation5 + $0x110] sm:$0xff]  }
 0x1ec   : > { %5474 = vmatprep.mubr.bf16.mxu0 %v7948_v45 }
 0x1f2   : > { %5107 = vmatmul.mubr.bf16.gmra.mrb[60].mxu1 %v1464_v0  ;;  %v7959_v0 = vld [vmem:[#allocation30_spill] sm:$0xff] }
 0x1f3   : > { %5475 = vmatmul.mubr.bf16.gmra.mrb[28].mxu0 %v7950_v6  ;;  %5126 = vmatprep.mubr.bf16.mxu1 %v7951_v28  ;;  %v7960_v28 = vld [vmem:[#allocation31_spill] sm:$0xff] }
 0x1f4   : > { %5478 = vmatprep.mubr.bf16.mxu0 %v7952_v35 }
 0x1fa   : > { %5127 = vmatmul.mubr.bf16.vlgmr.msra.gmra.mrb[0].mxu1 %v7953_v46  ;;  %v7961_v46 = vld [vmem:[#allocation32_spill] sm:$0xff] }
 0x1fb   : > { %5479 = vmatmul.mubr.bf16.gmra.mrb[32].mxu0 %v7954_v12  ;;  %5598 = vmatpush3.bf16.msra.mxu1 %v7210_v2  ;;  %v7958_v2 = vld [vmem:[#allocation29_spill] sm:$0xff] }
 0x1fc   : > { %5130 = vmatprep.mubr.bf16.mxu1 %v7032_v48  ;;  %5482 = vmatprep.mubr.bf16.mxu0 %v7955_v44  ;;  %v6281_v48 = vld [vmem:[#allocation5 + $0x120] sm:$0xff]  }
 0x1fd   : > { %5591 = vmatprep.subr.bf16.mxu1 %v6278_v60 }
 0x1ff   : > { %5599 = vmatpush3.bf16.msra.mxu1 %v6278_v60  ;;  %v2223_v60 = vshrl.u32 %v7096_v40, 16 }
 0x200   : > { %5592 = vmatprep.subr.bf16.mxu1 %v6279_v32 }
 0x202   : > { %5131 = vmatmul.mubr.bf16.gmra.mrb[4].mxu1 %v7045_v38  ;;  %v6282_v38 = vld [vmem:[#allocation5 + $0x128] sm:$0xff]  }
 0x203   : > { %5483 = vmatmul.mubr.bf16.gmra.mrb[36].mxu0 %v7956_v4  ;;  %5134 = vmatprep.mubr.bf16.mxu1 %v7050_v5  ;;  %v6283_v5 = vld [vmem:[#allocation5 + $0x130] sm:$0xff]  }
 0x204   : > { %5486 = vmatprep.mubr.bf16.mxu0 %v7957_v25  ;;  %5600 = vmatpush3.bf16.msra.mxu1 %v6279_v32  ;;  %v2227_v32 = vshll.u32 %v7106_v21, 16 }
 0x205   : > { %5593 = vmatprep.subr.bf16.mxu1 %v6280_v50 }
 0x208   : > { %5601 = vmatpush3.bf16.msra.mxu1 %v6280_v50  ;;  %v7963_v50 = vld [vmem:[#allocation35_spill] sm:$0xff] }
 0x209   : > { %5594 = vmatprep.subr.bf16.mxu1 %v6281_v48 }
 0x20a   : > { %5135 = vmatmul.mubr.bf16.gmra.mrb[8].mxu1 %v7063_v24  ;;  %v6284_v24 = vld [vmem:[#allocation5 + $0x138] sm:$0xff]  }
 0x20b   : > { %5487 = vmatmul.mubr.bf16.gmra.mrb[40].mxu0 %v7958_v2  ;;  %5138 = vmatprep.mubr.bf16.mxu1 %v7068_v30  ;;  %v2219_v30 = vshll.u32 %v7096_v40, 16 }
 0x20c   : > { %5490 = vmatprep.mubr.bf16.mxu0 %v7959_v0  ;;  %5602 = vmatpush3.bf16.msra.mxu1 %v6281_v48 }
 0x20d   : > { %5595 = vmatprep.subr.bf16.mxu1 %v6282_v38 }
 0x210   : > { %5603 = vmatpush3.bf16.msra.mxu1 %v6282_v38  ;;  %v2229_v38 = vrot.slane %v2227_v32, 1 }
 0x211   : > { %5596 = vmatprep.subr.bf16.mxu1 %v6283_v5 }
 0x212   : > { %5139 = vmatmul.mubr.bf16.gmra.mrb[12].mxu1 %v7084_v55  ;;  %v7962_v55 = vld [vmem:[#allocation34_spill] sm:$0xff]  ;;  %v7310_v32 = vor.u32 %v2231_v43, %v2229_v38  ;;  %v6287_v43 = vld [vmem:[%s6597_s3 + $0x80] sm:$0xff]  }
 0x213   : > { %5491 = vmatmul.mubr.bf16.gmra.mrb[44].mxu0 %v7960_v28  ;;  %5142 = vmatprep.mubr.bf16.mxu1 %v7154_v11  ;;  %v2221_v11 = vrot.slane %v2219_v30, 1  ;;  %v6285_v30 = vld [vmem:[%s6597_s3 + $0x70] sm:$0xff]  }
 0x214   : > { %5494 = vmatprep.mubr.bf16.mxu0 %v7961_v46  ;;  %5604 = vmatpush3.bf16.msra.mxu1 %v6283_v5  ;;  %v3327_v5 = vshll.u32 %v7223_v17, 16  ;;  %7966 = vst [vmem:[#allocation37_spill] sm:$0xff] %v7310_v32 }
 0x215   : > { %5597 = vmatprep.subr.bf16.mxu1 %v6284_v24  ;;  %v2225_v48 = vor.u32 %v2223_v60, %v2221_v11 }
 0x216   : > { %v3329_v60 = vrot.slane %v3327_v5, 1  ;;  %v6286_v5 = vld [vmem:[%s6597_s3 + $0x78] sm:$0xff]  }
 0x218   : > { %5605 = vmatpush3.bf16.msra.mxu1 %v6284_v24  ;;  %v7964_v24 = vld [vmem:[#allocation36_spill] sm:$0xff] }
 0x219   : > { %v7298_v29 = vsel %vm447_vm0, %v7964_v24, %v2221_v11  ;;  %v7313_v11 = vld [vmem:[%s6597_s3 + $0x120] ss:$0 sps:$4 sm:$0xff]  }
 0x21a   : > { %5143 = vmatmul.mubr.bf16.gmra.mrb[16].mxu1 %v7159_v8  ;;  %7965 = vst [vmem:[#allocation11_spill] sm:$0xff] %v7298_v29  ;;  %v7302_v8 = vsel %vm447_vm0, %v2225_v48, %v2229_v38 }
 0x21b   : > { %5495 = vmatmul.mubr.bf16.gmra.mrb[48].mxu0 %v7962_v55  ;;  %5146 = vmatprep.mubr.bf16.mxu1 %v7164_v13  ;;  %v3331_v55 = vshrl.u32 %v7223_v17, 16  ;;  %v3335_v13 = vshll.u32 %v7230_v23, 16  ;;  %v3330_v17 = vsel %vm447_vm0, %v7310_v32, %v3329_v60  ;;  %v6289_v32 = vld [vmem:[%s6597_s3 + $0x90] sm:$0xff]  }
 0x21c   : > { %5498 = vmatprep.mubr.bf16.mxu0 %v7963_v50 }
 0x21d   : > { %v3333_v48 = vor.u32 %v3331_v55, %v3329_v60  ;;  %v3337_v24 = vrot.slane %v3335_v13, 1  ;;  %v6288_v60 = vld [vmem:[%s6597_s3 + $0x88] sm:$0xff]  }
 0x222   : > { %5147 = vmatmul.mubr.bf16.gmra.mrb[20].mxu1 %v7172_v1  ;;  %v3339_v1 = vshrl.u32 %v7230_v23, 16 }
 0x223   : > { %5499 = vmatmul.mubr.bf16.gmra.mrb[52].mxu0 %v7298_v29  ;;  %5150 = vmatprep.mubr.bf16.mxu1 %v6285_v30  ;;  %v3343_v29 = vshll.u32 %v7313_v11, 16  ;;  %v3338_v30 = vsel %vm447_vm0, %v3333_v48, %v3337_v24  ;;  %v6291_v48 = vld [vmem:[%s6597_s3 + $0xa0] sm:$0xff]  }
 0x224   : > { %5502 = vmatprep.mubr.bf16.mxu0 %v7302_v8  ;;  %v3341_v55 = vor.u32 %v3339_v1, %v3337_v24  ;;  %v6293_v24 = vld [vmem:[%s6597_s3 + $0xb0] sm:$0xff]  }
 0x225   : > { %v3345_v38 = vrot.slane %v3343_v29, 1  ;;  %v6292_v29 = vld [vmem:[%s6597_s3 + $0xa8] sm:$0xff]  }
 0x227   : > { %v3346_v13 = vsel %vm447_vm0, %v3341_v55, %v3345_v38 }
 0x22a   : > { %5151 = vmatmul.mubr.bf16.gmra.mrb[24].mxu1 %v6286_v5 }
 0x22b   : > { %5503 = vmatmul.mubr.bf16.gmra.mrb[56].mxu0 %v3330_v17  ;;  %5154 = vmatprep.mubr.bf16.mxu1 %v6287_v43  ;;  %v6290_v17 = vld [vmem:[%s6597_s3 + $0x98] sm:$0xff]  }
 0x22c   : > { %5506 = vmatprep.mubr.bf16.mxu0 %v3338_v30 }
 0x232   : > { %5155 = vmatmul.mubr.bf16.gmra.mrb[28].mxu1 %v6288_v60 }
 0x233   : > { %5507 = vmatmul.mubr.bf16.gmra.mrb[60].mxu0 %v3346_v13  ;;  %5158 = vmatprep.mubr.bf16.mxu1 %v6289_v32  ;;  %v6294_v32 = vld [vmem:[%s6597_s3 + $0xb8] sm:$0xff]  }
 0x234   : > { %5526 = vmatprep.mubr.bf16.mxu0 %v6820_v26  ;;  %v6295_v26 = vld [vmem:[%s6597_s3 + $0xc0] sm:$0xff]  }
 0x23a   : > { %5159 = vmatmul.mubr.bf16.gmra.mrb[32].mxu1 %v6290_v17 }
 0x23b   : > { %5527 = vmatmul.mubr.bf16.vlgmr.msra.gmra.mrb[0].mxu0 %v6833_v51  ;;  %5162 = vmatprep.mubr.bf16.mxu1 %v6291_v48  ;;  %v3706_v51 = vrot.slane %v7230_v23, 1 }
 0x23c   : > { %5530 = vmatprep.mubr.bf16.mxu0 %v6839_v19 }
 0x242   : > { %5163 = vmatmul.mubr.bf16.gmra.mrb[36].mxu1 %v6292_v29 }
 0x243   : > { %5531 = vmatmul.mubr.bf16.gmra.mrb[4].mxu0 %v6853_v62  ;;  %5166 = vmatprep.mubr.bf16.mxu1 %v6293_v24 }
 0x244   : > { %5534 = vmatprep.mubr.bf16.mxu0 %v6861_v15 }
 0x24a   : > { %5167 = vmatmul.mubr.bf16.gmra.mrb[40].mxu1 %v6294_v32 }
 0x24b   : > { %5535 = vmatmul.mubr.bf16.gmra.mrb[8].mxu0 %v6881_v56  ;;  %5170 = vmatprep.mubr.bf16.mxu1 %v6295_v26  ;;  %v7974_v56 = vld [vmem:[#allocation37_spill] sm:$0xff] }
 0x24c   : > { %5538 = vmatprep.mubr.bf16.mxu0 %v6889_v42 }
 0x252   : > { %5171 = vmatmul.mubr.bf16.gmra.mrb[44].mxu1 %v6843_v53  ;;  %v7972_v53 = vld [vmem:[#allocation48_spill] sm:$0xff] }
 0x253   : > { %5539 = vmatmul.mubr.bf16.gmra.mrb[12].mxu0 %v6911_v41  ;;  %5174 = vmatprep.mubr.bf16.mxu1 %v6865_v16 }
 0x254   : > { %5542 = vmatprep.mubr.bf16.mxu0 %v6919_v52  ;;  %v7971_v52 = vld [vmem:[#allocation50_spill] sm:$0xff] }
 0x255   : > { %v2235_v19 = vshll.u32 %v7971_v52, 16 }
 0x257   : > { %v2237_v16 = vrot.slane %v2235_v19, 1 }
 0x259   : > { %v2238_v42 = vsel %vm447_vm0, %v7974_v56, %v2237_v16 }
 0x25a   : > { %5175 = vmatmul.mubr.bf16.gmra.mrb[48].mxu1 %v6872_v10  ;;  %v3708_v10 = vrot.slane %v7313_v11, 1 }
 0x25b   : > { %5543 = vmatmul.mubr.bf16.gmra.mrb[16].mxu0 %v6940_v59  ;;  %5178 = vmatprep.mubr.bf16.mxu1 %v6893_v39  ;;  %v7970_v39 = vld [vmem:[#allocation52_spill] sm:$0xff] }
 0x25c   : > { %5546 = vmatprep.mubr.bf16.mxu0 %v6951_v34  ;;  %v7969_v34 = vld [vmem:[#allocation51_spill] sm:$0xff] }
 0x262   : > { %5179 = vmatmul.mubr.bf16.gmra.mrb[52].mxu1 %v6900_v20  ;;  %v3709_v20 = vsel %vm1399_vm1, %v3706_v51, %v3708_v10 }
 0x263   : > { %5547 = vmatmul.mubr.bf16.gmra.mrb[20].mxu0 %v6969_v63  ;;  %5182 = vmatprep.mubr.bf16.mxu1 %v6924_v31 }
 0x264   : > { %5550 = vmatprep.mubr.bf16.mxu0 %v6975_v9  ;;  %v7968_v9 = vld [vmem:[#allocation49_spill] sm:$0xff] }
 0x26a   : > { %5183 = vmatmul.mubr.bf16.gmra.mrb[56].mxu1 %v6931_v49  ;;  %v3704_v49 = vrot.slane %v7970_v39, 1 }
 0x26b   : > { %5551 = vmatmul.mubr.bf16.gmra.mrb[24].mxu0 %v6988_v54  ;;  %5186 = vmatprep.mubr.bf16.mxu1 %v7096_v40 }
 0x26c   : > { %5554 = vmatprep.mubr.bf16.mxu0 %v6991_v14  ;;  %v3705_v62 = vsel %vm1399_vm1, %v7972_v53, %v3704_v49  ;;  %v3707_v15 = vsel %vm1399_vm1, %v3704_v49, %v3706_v51 }
 0x272   : > { %5187 = vmatmul.mubr.bf16.gmra.mrb[60].mxu1 %v7106_v21  ;;  %v7967_v21 = vld [vmem:[#allocation34_spill] sm:$0xff] }
 0x273   : > { %5555 = vmatmul.mubr.bf16.gmra.mrb[28].mxu0 %v7002_v47  ;;  %5238 = vmatprep.mubr.bf16.mxu1 %v7948_v45 }
 0x274   : > { %5558 = vmatprep.mubr.bf16.mxu0 %v7929_v57 }
 0x27a   : > { %5239 = vmatmul.mubr.bf16.vlgmr.msra.gmra.mrb[32].mxu1 %v7950_v6 }
 0x27b   : > { %5559 = vmatmul.mubr.bf16.gmra.mrb[32].mxu0 %v7931_v7  ;;  %5242 = vmatprep.mubr.bf16.mxu1 %v7952_v35 }
 0x27c   : > { %5562 = vmatprep.mubr.bf16.mxu0 %v7933_v61 }
 0x282   : > { %5243 = vmatmul.mubr.bf16.gmra.mrb[36].mxu1 %v7954_v12 }
 0x283   : > { %5563 = vmatmul.mubr.bf16.gmra.mrb[36].mxu0 %v7935_v22  ;;  %5246 = vmatprep.mubr.bf16.mxu1 %v7955_v44 }
 0x284   : > { %5566 = vmatprep.mubr.bf16.mxu0 %v7937_v18 }
 0x28a   : > { %5247 = vmatmul.mubr.bf16.gmra.mrb[40].mxu1 %v7956_v4 }
 0x28b   : > { %5567 = vmatmul.mubr.bf16.gmra.mrb[40].mxu0 %v7939_v36  ;;  %5250 = vmatprep.mubr.bf16.mxu1 %v7957_v25 }
 0x28c   : > { %5570 = vmatprep.mubr.bf16.mxu0 %v7941_v37 }
 0x292   : > { %5251 = vmatmul.mubr.bf16.gmra.mrb[44].mxu1 %v7958_v2 }
 0x293   : > { %5571 = vmatmul.mubr.bf16.gmra.mrb[44].mxu0 %v7943_v3  ;;  %5254 = vmatprep.mubr.bf16.mxu1 %v7959_v0 }
 0x294   : > { %5574 = vmatprep.mubr.bf16.mxu0 %v7080_v27 }
 0x29a   : > { %5255 = vmatmul.mubr.bf16.gmra.mrb[48].mxu1 %v7960_v28 }
 0x29b   : > { %5575 = vmatmul.mubr.bf16.gmra.mrb[48].mxu0 %v7099_v33  ;;  %5258 = vmatprep.mubr.bf16.mxu1 %v7961_v46 }
 0x29c   : > { %5578 = vmatprep.mubr.bf16.mxu0 %v7103_v58  ;;  %v7973_v58 = vld [vmem:[#allocation11_spill] sm:$0xff] }
 0x2a2   : > { %5259 = vmatmul.mubr.bf16.gmra.mrb[52].mxu1 %v7967_v21 }
 0x2a3   : > { %5579 = vmatmul.mubr.bf16.gmra.mrb[52].mxu0 %v7968_v9  ;;  %5262 = vmatprep.mubr.bf16.mxu1 %v7963_v50 }
 0x2a4   : > { %5582 = vmatprep.mubr.bf16.mxu0 %v7969_v34 }
 0x2aa   : > { %5263 = vmatmul.mubr.bf16.gmra.mrb[56].mxu1 %v7973_v58 }
 0x2ab   : > { %5583 = vmatmul.mubr.bf16.gmra.mrb[56].mxu0 %v3705_v62  ;;  %5266 = vmatprep.mubr.bf16.mxu1 %v7302_v8 }
 0x2ac   : > { %5586 = vmatprep.mubr.bf16.mxu0 %v3707_v15 }
 0x2b2   : > { %5267 = vmatmul.mubr.bf16.gmra.mrb[60].mxu1 %v2238_v42 }
 0x2b3   : > { %5587 = vmatmul.mubr.bf16.gmra.mrb[60].mxu0 %v3709_v20 }
 0x2cd   : > { %v5128_v41 = vpop.f32.mrb[0].mxu1 }
 0x2ce   : > { %v1943_v59 = vpop.f32.mrb[1].mxu1 }
 0x2cf   : > { %v5129_v31 = vpop.f32.mrb[2].mxu1 }
 0x2d0   : > { %v1946_v63 = vpop.f32.mrb[3].mxu1 }
 0x2d5   : > { %v5132_v54 = vpop.f32.mrb[4].mxu1 }
 0x2d6   : > { %v1957_v14 = vpop.f32.mrb[5].mxu1 }
 0x2d7   : > { %v5133_v47 = vpop.f32.mrb[6].mxu1 }
 0x2d8   : > { %v1960_v33 = vpop.f32.mrb[7].mxu1 }
 0x2dd   : > { %v5136_v27 = vpop.f32.mrb[8].mxu1 }
 0x2de   : > { %v1971_v40 = vpop.f32.mrb[9].mxu1 }
 0x2df   : > { %v5137_v23 = vpop.f32.mrb[10].mxu1 }
 0x2e0   : > { %v1974_v57 = vpop.f32.mrb[11].mxu1 }
 0x2e5   : > { %v5140_v7 = vpop.f32.mrb[12].mxu1 }
 0x2e6   : > { %v1985_v61 = vpop.f32.mrb[13].mxu1 }
 0x2e7   : > { %v5141_v22 = vpop.f32.mrb[14].mxu1 }
 0x2e8   : > { %v1988_v18 = vpop.f32.mrb[15].mxu1 }
 0x2ed   : > { %v5144_v36 = vpop.f32.mrb[16].mxu1 }
 0x2ee   : > { %v1999_v37 = vpop.f32.mrb[17].mxu1 }
 0x2ef   : > { %v5145_v3 = vpop.f32.mrb[18].mxu1 }
 0x2f0   : > { %v2002_v45 = vpop.f32.mrb[19].mxu1 }
 0x2f5   : > { %v5148_v6 = vpop.f32.mrb[20].mxu1 }
 0x2f6   : > { %v2013_v35 = vpop.f32.mrb[21].mxu1 }
 0x2f7   : > { %v5149_v12 = vpop.f32.mrb[22].mxu1 }
 0x2f8   : > { %v2016_v44 = vpop.f32.mrb[23].mxu1 }
 0x2fd   : > { %v5152_v4 = vpop.f32.mrb[24].mxu1 }
 0x2fe   : > { %v2027_v25 = vpop.f32.mrb[25].mxu1 }
 0x2ff   : > { %v5153_v2 = vpop.f32.mrb[26].mxu1 }
 0x300   : > { %v2030_v0 = vpop.f32.mrb[27].mxu1 }
 0x305   : > { %v5156_v28 = vpop.f32.mrb[28].mxu1 }
 0x306   : > { %v2041_v46 = vpop.f32.mrb[29].mxu1 }
 0x307   : > { %v5157_v50 = vpop.f32.mrb[30].mxu1 }
 0x308   : > { %v2044_v8 = vpop.f32.mrb[31].mxu1 }
 0x30e   : > { %v5528_v11 = vpop.f32.mrb[0].mxu0 }
 0x30f   : > { %v3795_v1 = vpop.f32.mrb[1].mxu0 }
 0x310   : > { %v7394_v30 = vadd.f32 %v3795_v1, %v1943_v59  ;;  %v5529_v5 = vpop.f32.mrb[2].mxu0 }
 0x311   : > { %v3798_v43 = vpop.f32.mrb[3].mxu0 }
 0x312   : > { %v7396_v55 = vadd.f32 %v3798_v43, %v1946_v63 }
 0x314   : > { %v4050_v53 = vadd.f32 %v7396_v55, %v7394_v30 }
 0x316   : > { %v5532_v38 = vpop.f32.mrb[4].mxu0 }
 0x317   : > { %v3809_v13 = vpop.f32.mrb[5].mxu0 }
 0x318   : > { %v7398_v60 = vadd.f32 %v3809_v13, %v1957_v14  ;;  %v5533_v17 = vpop.f32.mrb[6].mxu0 }
 0x319   : > { %v3812_v48 = vpop.f32.mrb[7].mxu0 }
 0x31a   : > { %v7400_v29 = vadd.f32 %v3812_v48, %v1960_v33  ;;  %v4051_v15 = vadd.f32 %v7398_v60, %v4050_v53 }
 0x31c   : > { %v4052_v10 = vadd.f32 %v7400_v29, %v4051_v15 }
 0x31e   : > { %v5536_v24 = vpop.f32.mrb[8].mxu0 }
 0x31f   : > { %v3823_v32 = vpop.f32.mrb[9].mxu0 }
 0x320   : > { %v7402_v26 = vadd.f32 %v3823_v32, %v1971_v40  ;;  %v5537_v21 = vpop.f32.mrb[10].mxu0 }
 0x321   : > { %v3826_v9 = vpop.f32.mrb[11].mxu0 }
 0x322   : > { %v7404_v34 = vadd.f32 %v3826_v9, %v1974_v57  ;;  %v4053_v41 = vadd.f32 %v7402_v26, %v4052_v10 }
 0x324   : > { %v4054_v31 = vadd.f32 %v7404_v34, %v4053_v41 }
 0x326   : > { %v5540_v39 = vpop.f32.mrb[12].mxu0 }
 0x327   : > { %v3837_v49 = vpop.f32.mrb[13].mxu0 }
 0x328   : > { %v7406_v51 = vadd.f32 %v3837_v49, %v1985_v61  ;;  %v5541_v52 = vpop.f32.mrb[14].mxu0 }
 0x329   : > { %v3840_v19 = vpop.f32.mrb[15].mxu0 }
 0x32a   : > { %v7410_v62 = vadd.f32 %v3840_v19, %v1988_v18  ;;  %v4055_v14 = vadd.f32 %v7406_v51, %v4054_v31 }
 0x32c   : > { %v4056_v23 = vadd.f32 %v7410_v62, %v4055_v14 }
 0x32e   : > { %v5544_v58 = vpop.f32.mrb[16].mxu0 }
 0x32f   : > { %v3851_v16 = vpop.f32.mrb[17].mxu0 }
 0x330   : > { %v7414_v56 = vadd.f32 %v3851_v16, %v1999_v37  ;;  %v5545_v42 = vpop.f32.mrb[18].mxu0 }
 0x331   : > { %v3854_v20 = vpop.f32.mrb[19].mxu0 }
 0x332   : > { %v7417_v59 = vadd.f32 %v3854_v20, %v2002_v45  ;;  %v4057_v57 = vadd.f32 %v7414_v56, %v4056_v23 }
 0x334   : > { %v4058_v37 = vadd.f32 %v7417_v59, %v4057_v57 }
 0x336   : > { %v5548_v63 = vpop.f32.mrb[20].mxu0 }
 0x337   : > { %v3865_v54 = vpop.f32.mrb[21].mxu0 }
 0x338   : > { %v7421_v47 = vadd.f32 %v3865_v54, %v2013_v35  ;;  %v5549_v33 = vpop.f32.mrb[22].mxu0 }
 0x339   : > { %v3868_v27 = vpop.f32.mrb[23].mxu0 }
 0x33a   : > { %v7423_v40 = vadd.f32 %v3868_v27, %v2016_v44  ;;  %v4059_v45 = vadd.f32 %v7421_v47, %v4058_v37 }
 0x33c   : > { %v4060_v12 = vadd.f32 %v7423_v40, %v4059_v45 }
 0x33e   : > { %v5552_v7 = vpop.f32.mrb[24].mxu0 }
 0x33f   : > { %v3879_v61 = vpop.f32.mrb[25].mxu0 }
 0x340   : > { %v7427_v22 = vadd.f32 %v3879_v61, %v2027_v25  ;;  %v5553_v18 = vpop.f32.mrb[26].mxu0 }
 0x341   : > { %v3882_v36 = vpop.f32.mrb[27].mxu0 }
 0x342   : > { %v7430_v3 = vadd.f32 %v3882_v36, %v2030_v0  ;;  %v4061_v28 = vadd.f32 %v7427_v22, %v4060_v12 }
 0x344   : > { %v4062_v11 = vadd.f32 %v7430_v3, %v4061_v28 }
 0x346   : > { %v5556_v6 = vpop.f32.mrb[28].mxu0 }
 0x347   : > { %v3893_v35 = vpop.f32.mrb[29].mxu0 }
 0x348   : > { %v7434_v44 = vadd.f32 %v3893_v35, %v2041_v46  ;;  %v5557_v4 = vpop.f32.mrb[30].mxu0 }
 0x349   : > { %v3896_v2 = vpop.f32.mrb[31].mxu0 }
 0x34a   : > { %v7437_v25 = vadd.f32 %v3896_v2, %v2044_v8  ;;  %v4063_v38 = vadd.f32 %v7434_v44, %v4062_v11 }
 0x34c   : > { %v4064_v32 = vadd.f32 %v7437_v25, %v4063_v38 }
 0x34d   : > { %v5240_v50 = vpop.f32.mrb[32].mxu1 }
 0x34e   : > { %v5560_v1 = vpop.f32.mrb[32].mxu0  ;;  %v2436_v0 = vpop.f32.mrb[33].mxu1 }
 0x34f   : > { %v3907_v5 = vpop.f32.mrb[33].mxu0  ;;  %v5241_v43 = vpop.f32.mrb[34].mxu1 }
 0x350   : > { %v7441_v13 = vadd.f32 %v3907_v5, %v2436_v0  ;;  %v5561_v17 = vpop.f32.mrb[34].mxu0  ;;  %v2439_v46 = vpop.f32.mrb[35].mxu1 }
 0x351   : > { %v3910_v48 = vpop.f32.mrb[35].mxu0 }
 0x352   : > { %v7443_v24 = vadd.f32 %v3910_v48, %v2439_v46  ;;  %v4065_v21 = vadd.f32 %v7441_v13, %v4064_v32 }
 0x354   : > { %v4066_v16 = vadd.f32 %v7443_v24, %v4065_v21 }
 0x355   : > { %v5244_v8 = vpop.f32.mrb[36].mxu1 }
 0x356   : > { %v5564_v9 = vpop.f32.mrb[36].mxu0  ;;  %v2450_v39 = vpop.f32.mrb[37].mxu1 }
 0x357   : > { %v3921_v49 = vpop.f32.mrb[37].mxu0  ;;  %v5245_v52 = vpop.f32.mrb[38].mxu1 }
 0x358   : > { %v7447_v19 = vadd.f32 %v3921_v49, %v2450_v39  ;;  %v5565_v53 = vpop.f32.mrb[38].mxu0  ;;  %v2453_v15 = vpop.f32.mrb[39].mxu1 }
 0x359   : > { %v3924_v58 = vpop.f32.mrb[39].mxu0 }
 0x35a   : > { %v7450_v10 = vadd.f32 %v3924_v58, %v2453_v15  ;;  %v4067_v42 = vadd.f32 %v7447_v19, %v4066_v16 }
 0x35c   : > { %v4068_v14 = vadd.f32 %v7450_v10, %v4067_v42 }
 0x35d   : > { %v5248_v20 = vpop.f32.mrb[40].mxu1 }
 0x35e   : > { %v5568_v41 = vpop.f32.mrb[40].mxu0  ;;  %v2464_v31 = vpop.f32.mrb[41].mxu1 }
 0x35f   : > { %v3935_v63 = vpop.f32.mrb[41].mxu0  ;;  %v5249_v54 = vpop.f32.mrb[42].mxu1 }
 0x360   : > { %v7454_v33 = vadd.f32 %v3935_v63, %v2464_v31  ;;  %v5569_v27 = vpop.f32.mrb[42].mxu0  ;;  %v2467_v23 = vpop.f32.mrb[43].mxu1 }
 0x361   : > { %v3938_v57 = vpop.f32.mrb[43].mxu0 }
 0x362   : > { %v4069_v7 = vadd.f32 %v7454_v33, %v4068_v14  ;;  %v7457_v61 = vadd.f32 %v3938_v57, %v2467_v23 }
 0x364   : > { %v4070_v18 = vadd.f32 %v7457_v61, %v4069_v7 }
 0x365   : > { %v5252_v36 = vpop.f32.mrb[44].mxu1 }
 0x366   : > { %v5572_v37 = vpop.f32.mrb[44].mxu0  ;;  %v2478_v45 = vpop.f32.mrb[45].mxu1 }
 0x367   : > { %v3949_v6 = vpop.f32.mrb[45].mxu0  ;;  %v5253_v35 = vpop.f32.mrb[46].mxu1 }
 0x368   : > { %v7460_v12 = vadd.f32 %v3949_v6, %v2478_v45  ;;  %v5573_v4 = vpop.f32.mrb[46].mxu0  ;;  %v2481_v2 = vpop.f32.mrb[47].mxu1 }
 0x369   : > { %v3952_v28 = vpop.f32.mrb[47].mxu0 }
 0x36a   : > { %v4071_v50 = vadd.f32 %v7460_v12, %v4070_v18  ;;  %v5629_v11 = vadd.f32 %v3952_v28, %v2481_v2 }
 0x36c   : > { %v4072_v1 = vadd.f32 %v5629_v11, %v4071_v50 }
 0x36d   : > { %v5256_v0 = vpop.f32.mrb[48].mxu1 }
 0x36e   : > { %v5576_v5 = vpop.f32.mrb[48].mxu0  ;;  %v2492_v43 = vpop.f32.mrb[49].mxu1 }
 0x36f   : > { %v3963_v38 = vpop.f32.mrb[49].mxu0  ;;  %v5257_v17 = vpop.f32.mrb[50].mxu1 }
 0x370   : > { %v5630_v46 = vadd.f32 %v3963_v38, %v2492_v43  ;;  %v5577_v48 = vpop.f32.mrb[50].mxu0  ;;  %v2495_v32 = vpop.f32.mrb[51].mxu1 }
 0x371   : > { %v3966_v8 = vpop.f32.mrb[51].mxu0 }
 0x372   : > { %v4073_v21 = vadd.f32 %v5630_v46, %v4072_v1  ;;  %v5631_v9 = vadd.f32 %v3966_v8, %v2495_v32 }
 0x374   : > { %v4074_v39 = vadd.f32 %v5631_v9, %v4073_v21 }
 0x375   : > { %v5260_v49 = vpop.f32.mrb[52].mxu1 }
 0x376   : > { %v5580_v52 = vpop.f32.mrb[52].mxu0  ;;  %v2506_v53 = vpop.f32.mrb[53].mxu1 }
 0x377   : > { %v3977_v15 = vpop.f32.mrb[53].mxu0  ;;  %v5261_v58 = vpop.f32.mrb[54].mxu1 }
 0x378   : > { %v5632_v16 = vadd.f32 %v3977_v15, %v2506_v53  ;;  %v5581_v42 = vpop.f32.mrb[54].mxu0  ;;  %v2509_v20 = vpop.f32.mrb[55].mxu1 }
 0x379   : > { %v3980_v41 = vpop.f32.mrb[55].mxu0 }
 0x37a   : > { %v4075_v31 = vadd.f32 %v5632_v16, %v4074_v39  ;;  %v5633_v63 = vadd.f32 %v3980_v41, %v2509_v20 }
 0x37c   : > { %v4076_v54 = vadd.f32 %v5633_v63, %v4075_v31 }
 0x37d   : > { %v5264_v14 = vpop.f32.mrb[56].mxu1 }
 0x37e   : > { %v5584_v27 = vpop.f32.mrb[56].mxu0  ;;  %v2520_v23 = vpop.f32.mrb[57].mxu1 }
 0x37f   : > { %v3991_v57 = vpop.f32.mrb[57].mxu0  ;;  %v5265_v7 = vpop.f32.mrb[58].mxu1 }
 0x380   : > { %v5634_v18 = vadd.f32 %v3991_v57, %v2520_v23  ;;  %v5585_v36 = vpop.f32.mrb[58].mxu0  ;;  %v2523_v37 = vpop.f32.mrb[59].mxu1 }
 0x381   : > { %v3994_v45 = vpop.f32.mrb[59].mxu0 }
 0x382   : > { %v4077_v6 = vadd.f32 %v5634_v18, %v4076_v54  ;;  %v5635_v35 = vadd.f32 %v3994_v45, %v2523_v37 }
 0x384   : > { %v4078_v4 = vadd.f32 %v5635_v35, %v4077_v6 }
 0x385   : > { %v5268_v2 = vpop.f32.mrb[60].mxu1 }
 0x386   : > { %v5588_v28 = vpop.f32.mrb[60].mxu0  ;;  %v2534_v50 = vpop.f32.mrb[61].mxu1 }
 0x387   : > { %v4005_v1 = vpop.f32.mrb[61].mxu0  ;;  %v5269_v0 = vpop.f32.mrb[62].mxu1 }
 0x388   : > { %v5636_v5 = vadd.f32 %v4005_v1, %v2534_v50  ;;  %v5589_v43 = vpop.f32.mrb[62].mxu0  ;;  %v2537_v38 = vpop.f32.mrb[63].mxu1 }
 0x389   : > { %v4008_v17 = vpop.f32.mrb[63].mxu0 }
 0x38a   : > { %v4079_v48 = vadd.f32 %v5636_v5, %v4078_v4  ;;  %v5637_v32 = vadd.f32 %v4008_v17, %v2537_v38 }
 0x38c   : > { %v4080_v8 = vadd.f32 %v5637_v32, %v4079_v48 }
 0x38e   : > { %v4081_v21 = vrot.slane %v4080_v8, 4 }
 0x390   : > { %v4082_v39 = vadd.f32 %v4081_v21, %v4080_v8 }
 0x392   : > { %v4083_v49 = vrot.slane %v4082_v39, 2 }
 0x394   : > { %v4084_v52 = vadd.f32 %v4083_v49, %v4082_v39 }
 0x396   : > { %v4085_v53 = vrot.slane %v4084_v52, 1 }
 0x398   : > { %v4086_v15 = vadd.f32 %v4085_v53, %v4084_v52 }
 0x39a   : > { %v7463_v58 = vmul.f32 0.00390625, %v4086_v15 }
 0x39c   : > { %v7467_v42 = vsub.f32 %v7454_v33, %v7463_v58  ;;  %v7471_v20 = vsub.f32 %v7457_v61, %v7463_v58  ;;  %v7475_v41 = vsub.f32 %v7460_v12, %v7463_v58  ;;  %v7478_v31 = vsub.f32 %v5629_v11, %v7463_v58 }
 0x39d   : > { %v7481_v54 = vsub.f32 %v5630_v46, %v7463_v58  ;;  %v7484_v14 = vsub.f32 %v5631_v9, %v7463_v58  ;;  %v7487_v33 = vsub.f32 %v5632_v16, %v7463_v58  ;;  %v7490_v27 = vsub.f32 %v5633_v63, %v7463_v58 }
 0x39e   : > { %v7493_v61 = vsub.f32 %v5634_v18, %v7463_v58  ;;  %v7496_v12 = vsub.f32 %v5635_v35, %v7463_v58  ;;  %v7499_v11 = vsub.f32 %v5636_v5, %v7463_v58  ;;  %v7502_v46 = vsub.f32 %v5637_v32, %v7463_v58 }
 0x39f   : > { %v7506_v9 = vsub.f32 %v7394_v30, %v7463_v58  ;;  %v7510_v16 = vsub.f32 %v7396_v55, %v7463_v58  ;;  %v7514_v63 = vsub.f32 %v7398_v60, %v7463_v58  ;;  %v7522_v7 = vsub.f32 %v7400_v29, %v7463_v58 }
 0x3a0   : > { %v7526_v30 = vsub.f32 %v7402_v26, %v7463_v58  ;;  %v7532_v60 = vsub.f32 %v7404_v34, %v7463_v58  ;;  %v7538_v29 = vsub.f32 %v7406_v51, %v7463_v58  ;;  %v7544_v6 = vsub.f32 %v7410_v62, %v7463_v58 }
 0x3a1   : > { %v4120_v23 = vmul.f32 %v7506_v9, %v7506_v9  ;;  %v4121_v57 = vmul.f32 %v7510_v16, %v7510_v16  ;;  %v4122_v55 = vmul.f32 %v7514_v63, %v7514_v63  ;;  %v4123_v36 = vmul.f32 %v7522_v7, %v7522_v7 }
 0x3a2   : > { %v4124_v26 = vmul.f32 %v7526_v30, %v7526_v30  ;;  %v4125_v34 = vmul.f32 %v7532_v60, %v7532_v60  ;;  %v7550_v4 = vsub.f32 %v7414_v56, %v7463_v58  ;;  %v4126_v51 = vmul.f32 %v7538_v29, %v7538_v29 }
 0x3a3   : > { %v4152_v18 = vadd.f32 %v4121_v57, %v4120_v23  ;;  %v7556_v28 = vsub.f32 %v7417_v59, %v7463_v58  ;;  %v4127_v62 = vmul.f32 %v7544_v6, %v7544_v6  ;;  %v7562_v1 = vsub.f32 %v7421_v47, %v7463_v58 }
 0x3a4   : > { %v4128_v56 = vmul.f32 %v7550_v4, %v7550_v4  ;;  %v7568_v5 = vsub.f32 %v7423_v40, %v7463_v58  ;;  %v7574_v38 = vsub.f32 %v7427_v22, %v7463_v58  ;;  %v7580_v48 = vsub.f32 %v7430_v3, %v7463_v58 }
 0x3a5   : > { %v4153_v37 = vadd.f32 %v4152_v18, %v4122_v55  ;;  %v4129_v59 = vmul.f32 %v7556_v28, %v7556_v28  ;;  %v4130_v47 = vmul.f32 %v7562_v1, %v7562_v1  ;;  %v7586_v8 = vsub.f32 %v7434_v44, %v7463_v58 }
 0x3a6   : > { %v4131_v40 = vmul.f32 %v7568_v5, %v7568_v5  ;;  %v4132_v22 = vmul.f32 %v7574_v38, %v7574_v38  ;;  %v7592_v39 = vsub.f32 %v7437_v25, %v7463_v58  ;;  %v4133_v3 = vmul.f32 %v7580_v48, %v7580_v48 }
 0x3a7   : > { %v4154_v45 = vadd.f32 %v4153_v37, %v4123_v36  ;;  %v7598_v52 = vsub.f32 %v7441_v13, %v7463_v58  ;;  %v4134_v44 = vmul.f32 %v7586_v8, %v7586_v8  ;;  %v7604_v15 = vsub.f32 %v7443_v24, %v7463_v58 }
 0x3a8   : > { %v4135_v25 = vmul.f32 %v7592_v39, %v7592_v39  ;;  %v7610_v57 = vsub.f32 %v7447_v19, %v7463_v58  ;;  %v7616_v18 = vsub.f32 %v7450_v10, %v7463_v58  ;;  %v4141_v10 = vmul.f32 %v7471_v20, %v7471_v20 }
 0x3a9   : > { %v4155_v35 = vadd.f32 %v4154_v45, %v4124_v26  ;;  %v4136_v13 = vmul.f32 %v7598_v52, %v7598_v52  ;;  %v4137_v24 = vmul.f32 %v7604_v15, %v7604_v15 }
 0x3aa   : > { %v4138_v37 = vmul.f32 %v7610_v57, %v7610_v57  ;;  %v4139_v19 = vmul.f32 %v7616_v18, %v7616_v18 }
 0x3ab   : > { %v4156_v2 = vadd.f32 %v4155_v35, %v4125_v34  ;;  %v4140_v34 = vmul.f32 %v7467_v42, %v7467_v42 }
 0x3ad   : > { %v4157_v50 = vadd.f32 %v4156_v2, %v4126_v51  ;;  %v4142_v51 = vmul.f32 %v7475_v41, %v7475_v41 }
 0x3af   : > { %v4158_v0 = vadd.f32 %v4157_v50, %v4127_v62  ;;  %v4143_v62 = vmul.f32 %v7478_v31, %v7478_v31 }
 0x3b1   : > { %v4159_v43 = vadd.f32 %v4158_v0, %v4128_v56  ;;  %v4144_v56 = vmul.f32 %v7481_v54, %v7481_v54 }
 0x3b3   : > { %v4160_v17 = vadd.f32 %v4159_v43, %v4129_v59  ;;  %v4145_v59 = vmul.f32 %v7484_v14, %v7484_v14 }
 0x3b5   : > { %v4161_v32 = vadd.f32 %v4160_v17, %v4130_v47  ;;  %v4146_v47 = vmul.f32 %v7487_v33, %v7487_v33 }
 0x3b7   : > { %v4162_v21 = vadd.f32 %v4161_v32, %v4131_v40  ;;  %v4147_v40 = vmul.f32 %v7490_v27, %v7490_v27 }
 0x3b9   : > { %v4163_v49 = vadd.f32 %v4162_v21, %v4132_v22  ;;  %v4148_v22 = vmul.f32 %v7493_v61, %v7493_v61 }
 0x3bb   : > { %v4164_v53 = vadd.f32 %v4163_v49, %v4133_v3  ;;  %v4149_v3 = vmul.f32 %v7496_v12, %v7496_v12 }
 0x3bd   : > { %v4165_v23 = vadd.f32 %v4164_v53, %v4134_v44  ;;  %v4150_v44 = vmul.f32 %v7499_v11, %v7499_v11 }
 0x3bf   : > { %v4166_v55 = vadd.f32 %v4165_v23, %v4135_v25  ;;  %v4151_v25 = vmul.f32 %v7502_v46, %v7502_v46 }
 0x3c1   : > { %v4167_v36 = vadd.f32 %v4166_v55, %v4136_v13 }
 0x3c3   : > { %v4168_v26 = vadd.f32 %v4167_v36, %v4137_v24 }
 0x3c5   : > { %v4169_v45 = vadd.f32 %v4168_v26, %v4138_v37 }
 0x3c7   : > { %v4170_v35 = vadd.f32 %v4169_v45, %v4139_v19 }
 0x3c9   : > { %v4171_v58 = vadd.f32 %v4170_v35, %v4140_v34 }
 0x3cb   : > { %v4172_v2 = vadd.f32 %v4171_v58, %v4141_v10 }
 0x3cd   : > { %v4173_v50 = vadd.f32 %v4172_v2, %v4142_v51 }
 0x3cf   : > { %v4174_v0 = vadd.f32 %v4173_v50, %v4143_v62 }
 0x3d1   : > { %v4175_v43 = vadd.f32 %v4174_v0, %v4144_v56 }
 0x3d3   : > { %v4176_v17 = vadd.f32 %v4175_v43, %v4145_v59 }
 0x3d5   : > { %v4177_v32 = vadd.f32 %v4176_v17, %v4146_v47 }
 0x3d7   : > { %v4178_v21 = vadd.f32 %v4177_v32, %v4147_v40 }
 0x3d9   : > { %v4179_v49 = vadd.f32 %v4178_v21, %v4148_v22 }
 0x3db   : > { %v4180_v53 = vadd.f32 %v4179_v49, %v4149_v3 }
 0x3dd   : > { %v4181_v23 = vadd.f32 %v4180_v53, %v4150_v44 }
 0x3df   : > { %v4182_v13 = vadd.f32 %v4181_v23, %v4151_v25 }
 0x3e1   : > { %v4183_v55 = vrot.slane %v4182_v13, 4 }
 0x3e3   : > { %v4184_v24 = vadd.f32 %v4183_v55, %v4182_v13 }
 0x3e5   : > { %v4185_v36 = vrot.slane %v4184_v24, 2 }
 0x3e7   : > { %v4186_v37 = vadd.f32 %v4185_v36, %v4184_v24 }
 0x3e9   : > { %v4187_v26 = vrot.slane %v4186_v37, 1 }
 0x3eb   : > { %v4188_v19 = vadd.f32 %v4187_v26, %v4186_v37 }
 0x3ed   : > { %v4189_v45 = vmul.f32 0.00390625, %v4188_v19 }
 0x3ef   : > { %v4190_v34 = vadd.f32 1e-05, %v4189_v45 }
 0x3f1   : > { %6261 = vrsqrt.f32 %v4190_v34 }
 0x3fb   : > { %v6262_v35 = vpop.eup %6261 }
 0x3fc   : > { %v4223_v10 = vmul.f32 %v6262_v35, %v7502_v46  ;;  %v4192_v58 = vmul.f32 %v6262_v35, %v7506_v9  ;;  %v4193_v51 = vmul.f32 %v6262_v35, %v7510_v16  ;;  %v4194_v2 = vmul.f32 %v6262_v35, %v7514_v63 }
 0x3fd   : > { %v4195_v62 = vmul.f32 %v6262_v35, %v7522_v7  ;;  %v4196_v50 = vmul.f32 %v6262_v35, %v7526_v30  ;;  %v4197_v56 = vmul.f32 %v6262_v35, %v7532_v60  ;;  %v4198_v0 = vmul.f32 %v6262_v35, %v7538_v29 }
 0x3fe   : > { %v4255_v59 = vmax.f32 %v4223_v10, 0.0  ;;  %v4199_v43 = vmul.f32 %v6262_v35, %v7544_v6  ;;  %v4200_v47 = vmul.f32 %v6262_v35, %v7550_v4  ;;  %v4201_v46 = vmul.f32 %v6262_v35, %v7556_v28 }
 0x3ff   : > { %v4202_v9 = vmul.f32 %v6262_v35, %v7562_v1  ;;  %v4203_v16 = vmul.f32 %v6262_v35, %v7568_v5  ;;  %v4204_v63 = vmul.f32 %v6262_v35, %v7574_v38  ;;  %v4205_v7 = vmul.f32 %v6262_v35, %v7580_v48 }
 0x400   : > { %4287 = vst [vmem:[%s7664_s17 + $0xf8] sm:$0xff] %v4255_v59  ;;  %v4206_v30 = vmul.f32 %v6262_v35, %v7586_v8  ;;  %v4207_v60 = vmul.f32 %v6262_v35, %v7592_v39  ;;  %v4208_v29 = vmul.f32 %v6262_v35, %v7598_v52  ;;  %v4209_v6 = vmul.f32 %v6262_v35, %v7604_v15 }
 0x401   : > { %v4210_v4 = vmul.f32 %v6262_v35, %v7610_v57  ;;  %v7673_v28 = vmul.f32 %v6262_v35, %v7616_v18  ;;  %v7676_v1 = vmul.f32 %v6262_v35, %v7467_v42  ;;  %v7679_v5 = vmul.f32 %v6262_v35, %v7471_v20 }
 0x402   : > { %v7682_v38 = vmul.f32 %v6262_v35, %v7475_v41  ;;  %v7685_v48 = vmul.f32 %v6262_v35, %v7478_v31  ;;  %v7688_v8 = vmul.f32 %v6262_v35, %v7481_v54  ;;  %v7691_v39 = vmul.f32 %v6262_v35, %v7484_v14 }
 0x403   : > { %v7694_v52 = vmul.f32 %v6262_v35, %v7487_v33  ;;  %v7697_v42 = vmul.f32 %v6262_v35, %v7490_v27  ;;  %v7700_v20 = vmul.f32 %v6262_v35, %v7493_v61  ;;  %v7703_v41 = vmul.f32 %v6262_v35, %v7496_v12 }
 0x404   : > { %v7706_v31 = vmul.f32 %v6262_v35, %v7499_v11  ;;  %v4224_v54 = vmax.f32 %v4192_v58, 0.0  ;;  %v4225_v14 = vmax.f32 %v4193_v51, 0.0  ;;  %v4226_v15 = vmax.f32 %v4194_v2, 0.0 }
 0x405   : > { %v4227_v33 = vmax.f32 %v4195_v62, 0.0  ;;  %v4228_v57 = vmax.f32 %v4196_v50, 0.0  ;;  %v4229_v27 = vmax.f32 %v4197_v56, 0.0  ;;  %v4230_v18 = vmax.f32 %v4198_v0, 0.0 }
 0x406   : > { %v4231_v61 = vmax.f32 %v4199_v43, 0.0  ;;  %v4232_v17 = vmax.f32 %v4200_v47, 0.0  ;;  %v4233_v12 = vmax.f32 %v4201_v46, 0.0  ;;  %v4234_v40 = vmax.f32 %v4202_v9, 0.0  ;;  %4256 = vst [vmem:[%s7664_s17] sm:$0xff] %v4224_v54  ;;  %4257 = vst [vmem:[%s7664_s17 + $0x8] sm:$0xff] %v4225_v14 }
 0x407   : > { %4258 = vst [vmem:[%s7664_s17 + $0x10] sm:$0xff] %v4226_v15  ;;  %v4235_v11 = vmax.f32 %v4203_v16, 0.0  ;;  %v4236_v32 = vmax.f32 %v4204_v63, 0.0  ;;  %v4237_v22 = vmax.f32 %v4205_v7, 0.0  ;;  %v4238_v21 = vmax.f32 %v4206_v30, 0.0  ;;  %4259 = vst [vmem:[%s7664_s17 + $0x18] sm:$0xff] %v4227_v33 }
 0x408   : > { %4260 = vst [vmem:[%s7664_s17 + $0x20] sm:$0xff] %v4228_v57  ;;  %4261 = vst [vmem:[%s7664_s17 + $0x28] sm:$0xff] %v4229_v27  ;;  %v4239_v3 = vmax.f32 %v4207_v60, 0.0  ;;  %v4240_v49 = vmax.f32 %v4208_v29, 0.0  ;;  %v4241_v44 = vmax.f32 %v4209_v6, 0.0  ;;  %v4242_v53 = vmax.f32 %v4210_v4, 0.0 }
 0x409   : > { %4262 = vst [vmem:[%s7664_s17 + $0x30] sm:$0xff] %v4230_v18  ;;  %4263 = vst [vmem:[%s7664_s17 + $0x38] sm:$0xff] %v4231_v61  ;;  %v4243_v25 = vmax.f32 %v7673_v28, 0.0  ;;  %v4244_v23 = vmax.f32 %v7676_v1, 0.0  ;;  %v4245_v13 = vmax.f32 %v7679_v5, 0.0  ;;  %v4246_v55 = vmax.f32 %v7682_v38, 0.0 }
 0x40a   : > { %4264 = vst [vmem:[%s7664_s17 + $0x40] sm:$0xff] %v4232_v17  ;;  %4265 = vst [vmem:[%s7664_s17 + $0x48] sm:$0xff] %v4233_v12  ;;  %v4247_v24 = vmax.f32 %v7685_v48, 0.0  ;;  %v4248_v36 = vmax.f32 %v7688_v8, 0.0  ;;  %v4249_v37 = vmax.f32 %v7691_v39, 0.0  ;;  %v4250_v26 = vmax.f32 %v7694_v52, 0.0 }
 0x40b   : > { %4266 = vst [vmem:[%s7664_s17 + $0x50] sm:$0xff] %v4234_v40  ;;  %4267 = vst [vmem:[%s7664_s17 + $0x58] sm:$0xff] %v4235_v11  ;;  %v4251_v19 = vmax.f32 %v7697_v42, 0.0  ;;  %v4252_v45 = vmax.f32 %v7700_v20, 0.0  ;;  %v4253_v34 = vmax.f32 %v7703_v41, 0.0  ;;  %v4254_v35 = vmax.f32 %v7706_v31, 0.0 }
 0x40c   : > { %4268 = vst [vmem:[%s7664_s17 + $0x60] sm:$0xff] %v4236_v32  ;;  %4269 = vst [vmem:[%s7664_s17 + $0x68] sm:$0xff] %v4237_v22 }
 0x40d   : > { %4270 = vst [vmem:[%s7664_s17 + $0x70] sm:$0xff] %v4238_v21  ;;  %4271 = vst [vmem:[%s7664_s17 + $0x78] sm:$0xff] %v4239_v3 }
 0x40e   : > { %4272 = vst [vmem:[%s7664_s17 + $0x80] sm:$0xff] %v4240_v49  ;;  %4273 = vst [vmem:[%s7664_s17 + $0x88] sm:$0xff] %v4241_v44 }
 0x40f   : > { %4274 = vst [vmem:[%s7664_s17 + $0x90] sm:$0xff] %v4242_v53  ;;  %4275 = vst [vmem:[%s7664_s17 + $0x98] sm:$0xff] %v4243_v25 }
 0x410   : > { %4276 = vst [vmem:[%s7664_s17 + $0xa0] sm:$0xff] %v4244_v23  ;;  %4277 = vst [vmem:[%s7664_s17 + $0xa8] sm:$0xff] %v4245_v13 }
 0x411   : > { %4278 = vst [vmem:[%s7664_s17 + $0xb0] sm:$0xff] %v4246_v55  ;;  %4279 = vst [vmem:[%s7664_s17 + $0xb8] sm:$0xff] %v4247_v24 }
 0x412   : > { %4280 = vst [vmem:[%s7664_s17 + $0xc0] sm:$0xff] %v4248_v36  ;;  %4281 = vst [vmem:[%s7664_s17 + $0xc8] sm:$0xff] %v4249_v37 }
 0x413   : > { %4282 = vst [vmem:[%s7664_s17 + $0xd0] sm:$0xff] %v4250_v26  ;;  %4283 = vst [vmem:[%s7664_s17 + $0xd8] sm:$0xff] %v4251_v19 }
 0x414   : > { %4284 = vst [vmem:[%s7664_s17 + $0xe0] sm:$0xff] %v4252_v45  ;;  %4285 = vst [vmem:[%s7664_s17 + $0xe8] sm:$0xff] %v4253_v34 }
 0x415   : > { %4286 = vst [vmem:[%s7664_s17 + $0xf0] sm:$0xff] %v4254_v35 }
 0x416   : > { %6367 = shalt.err (!%p6364_p7)
}
 0x417   : > { %s6368_s18 = scalar_lea.hbm %s7740_s22, 4096  ;;  %s6372_s23 = scalar_lea.hbm %s7804_s2, 8192 }
 0x418   : > { %p6369_p9 = scmp.ne.s32.totalorder %s7740_s22, %s6368_s18  ;;  %p6373_p5 = scmp.lt.u32.totalorder %s7740_s22, %s7804_s2 }
 0x419   : > { %p6374_p13 = scmp.lt.u32.totalorder %s6372_s23, %s6368_s18  ;;  %p6376_p4 = scmp.lt.u32.totalorder %s6368_s18, %s7740_s22 }
 0x41a   : > { %p6370_p1 = pnand %p6369_p9, %p6542_p12 }
 0x41b   : > { %p6375_p2 = por %p6374_p13, %p6373_p5 }
 0x41c   : > { %p6371_p0 = pneg %p6370_p1 }
 0x41d   : > { %p6377_p6 = por %p6376_p4, %p6375_p2 }
 0x41f   : > { %p6378_p8 = pnand %p6377_p6, %p6371_p0 }
 0x421   : > { %6381 = shalt.err (!%p6378_p8)
}
 0x422   : > { %s6431_s3 = smov 128   ;;  %s6432_s15 = smov 8  }
 0x423   : > { %6095 = dma.vmem_to_hbm [thread:$0]  (%p6542_p12), %s7742_s5, 4096, %s7740_s22, %s4289_s27, %s6431_s3, %s6431_s3, %s6432_s15  }
 0x424 PF: > { %s4317_s17 = sand.u32 1, %s6412_s9   ;;  %p7975_p10 = scmp.ne.s32.totalorder %s7875_s16, 0 }
 0x425   : > { %p7976_p11 = scmp.ge.s32.totalorder %s6424_s12, 2  ;;  %s4318_s4 = scalar_lea.sflag [#allocation4], %s4317_s17 }
 0x427   : > { %p6106_p3 = pnand %p7976_p11, %p7975_p10 }
 0x429   : > { %6407 = dma.done.wait (!%p6106_p3), %s4318_s4, 4096  }
 0x42a   : > { %6409 = vsyncadd (!%p6106_p3), %s4318_s4, 4294963200  ;;  %p16_p7 = scmp.ge.s32.totalorder %s6504_s21, 4   ;;  %s7977_s9 = smov %s6416_s10 }
 0x42b   : > { %s7978_s10 = smov %s6420_s11  ;;  %s7979_s11 = smov %s6538_s8 }
 0x42c   : > { %s7980_s12 = smov %s6504_s21  ;;  %18 = sbr.rel (!%p16_p7) target bundleno = 6 (0x6), region = 85 }
 0x433   :  { %4323 = vsyncpa [#allocation3], 1 }
 0x434   :  { %4325 = vsyncpa [#allocation3 + $0x1], 1 }
 0x435   :  { %4326 = vsyncpa [#allocation6], 1 }
 0x436   :  { %4327 = vsyncpa [#allocation4], 1 }
 0x437   :  { %4329 = vsyncpa [#allocation4 + $0x1], 1 }

</bundles_post_ra>
